<compile_context>
chip_gen: v7x
topology: tpu7x:2x2x1
jax: 0.10.0
libtpu: 0.0.40
codegen_flags: <defaults>
</compile_context>

<pallas_src>
import jax
import jax.numpy as jnp
from jax.experimental import pallas as pl
from jax.experimental.pallas import tpu as pltpu

_LANE = 128
# Stay below v5e's 16 MiB scoped-VMEM default so no vmem_limit override is
# needed on any generation (v6e/v7x default to 32 MiB scoped).
_VMEM_SOFT_LIMIT = 12 * 1024 * 1024


def _round_up(x, m):
    return (x + m - 1) // m * m


def _choose_tiling(n):
    """Pick (n_pad, tile_m, tile_k).

    tile_k (reduction/column tile of A) is chosen to minimize n_pad: padding
    waste is quadratic in the dominant A stream, so the smallest padded size
    wins over any fixed-tile preference (ties -> larger tile).  tile_m (row
    tile) is decoupled and raised toward 1024 where it divides n_pad,
    amortizing per-grid-step overhead and cutting V re-streams.
    """
    n128 = _round_up(max(int(n), 1), _LANE)
    n_pad, neg_tk = min((_round_up(n128, tk), -tk) for tk in (512, 256, 128))
    tile_k = -neg_tk
    tile_m = next(tm for tm in (1024, 512, 256, 128) if n_pad % tm == 0)
    return n_pad, tile_m, tile_k


# ---------------------------------------------------------------------------
# Kernel 1 (small): V = d_inv_sqrt * (X @ W), cast to bf16, row-tiled.
# ---------------------------------------------------------------------------
def _xw_scale_kernel(x_ref, w_ref, d_ref, v_ref):
    # Padded rows have d == 0, so their V rows are exactly zero and contribute
    # nothing to the aggregation regardless of the padded-row contents of X.
    x = x_ref[...].astype(jnp.float32)   # no-op for f32 x; upcasts bf16 h1
    xw = jnp.dot(x, w_ref[...], preferred_element_type=jnp.float32)
    v_ref[...] = (d_ref[...] * xw).astype(v_ref.dtype)


def _xw_scale(x, w, d_col, *, tile_m):
    n_pad, f_in = x.shape
    f_out = w.shape[1]
    return pl.pallas_call(
        _xw_scale_kernel,
        out_shape=jax.ShapeDtypeStruct((n_pad, f_out), jnp.bfloat16),
        grid=(n_pad // tile_m,),
        in_specs=[
            pl.BlockSpec((tile_m, f_in), lambda i: (i, 0)),
            pl.BlockSpec((f_in, f_out), lambda i: (0, 0)),
            pl.BlockSpec((tile_m, 1), lambda i: (i, 0)),
        ],
        out_specs=pl.BlockSpec((tile_m, f_out), lambda i: (i, 0)),
        compiler_params=pltpu.CompilerParams(
            dimension_semantics=("parallel",)),
    )(x, w, d_col)


# ---------------------------------------------------------------------------
# Kernel 2 (dominant): out = tanh(d_row * (A_hat @ V) + b)
#   grid = (row tiles [parallel], k tiles [arbitrary, reduction last])
#   A_hat streamed as int8 and upcast to bf16 in-kernel; V VMEM-resident when
#   it fits; f32 accumulator; bias + tanh + row scaling only on the last k.
# ---------------------------------------------------------------------------
def _make_agg_kernel(tile_k, v_resident):
    def kernel(a_ref, v_ref, d_ref, b_ref, o_ref, acc_ref):
        k = pl.program_id(1)

        @pl.when(k == 0)
        def _init():
            acc_ref[...] = jnp.zeros_like(acc_ref)

        # int8 -> bf16 upcast is a VPU op; free under the HBM DMA bottleneck.
        a_tile = a_ref[...].astype(jnp.bfloat16)
        if v_resident:
            start = pl.multiple_of(k * tile_k, tile_k)
            v_tile = v_ref[pl.ds(start, tile_k), :]
        else:
            v_tile = v_ref[...]
        acc_ref[...] += jnp.dot(a_tile, v_tile,
                                preferred_element_type=jnp.float32)

        @pl.when(k == pl.num_programs(1) - 1)
        def _epilogue():
            o_ref[...] = jnp.tanh(
                d_ref[...] * acc_ref[...] + b_ref[...]).astype(o_ref.dtype)

    return kernel


def _agg_vmem_bytes(n_pad, tile_m, tile_k, f_out, v_resident, out_itemsize):
    a = 2 * tile_m * tile_k                                  # int8, 2 buffers
    v = 2 * (n_pad if v_resident else tile_k) * f_out * 2    # bf16
    d = 2 * tile_m * 4
    b = 2 * f_out * 4
    acc = tile_m * f_out * 4
    o = 2 * tile_m * f_out * out_itemsize
    return a + v + d + b + acc + o


def _aggregate(a_hat, v, d_col, bias_row, *, tile_m, tile_k, out_dtype):
    n_pad = a_hat.shape[0]
    f_out = v.shape[1]
    out_itemsize = jnp.dtype(out_dtype).itemsize

    # Prefer a fully VMEM-resident V (constant block index -> fetched once,
    # no per-row-tile re-streaming); otherwise stream V per k-tile and, if
    # still over budget, shrink the row tile.
    v_resident = _agg_vmem_bytes(
        n_pad, tile_m, tile_k, f_out, True, out_itemsize) <= _VMEM_SOFT_LIMIT
    while (not v_resident and tile_m > _LANE and
           _agg_vmem_bytes(n_pad, tile_m, tile_k, f_out, False,
                           out_itemsize) > _VMEM_SOFT_LIMIT):
        tile_m //= 2

    if v_resident:
        v_spec = pl.BlockSpec((n_pad, f_out), lambda i, k: (0, 0))
        v_stream_bytes = n_pad * f_out * 2
    else:
        v_spec = pl.BlockSpec((tile_k, f_out), lambda i, k: (k, 0))
        v_stream_bytes = (n_pad // tile_m) * n_pad * f_out * 2

    cost = pl.CostEstimate(
        flops=2 * n_pad * n_pad * f_out,
        transcendentals=n_pad * f_out,
        bytes_accessed=(n_pad * n_pad                    # int8 A stream
                        + v_stream_bytes                 # bf16 V
                        + n_pad * f_out * out_itemsize   # output
                        + n_pad * 4 + f_out * 4),
    )
    return pl.pallas_call(
        _make_agg_kernel(tile_k, v_resident),
        out_shape=jax.ShapeDtypeStruct((n_pad, f_out), out_dtype),
        grid=(n_pad // tile_m, n_pad // tile_k),
        in_specs=[
            pl.BlockSpec((tile_m, tile_k), lambda i, k: (i, k)),
            v_spec,
            pl.BlockSpec((tile_m, 1), lambda i, k: (i, 0)),
            pl.BlockSpec((1, f_out), lambda i, k: (0, 0)),
        ],
        out_specs=pl.BlockSpec((tile_m, f_out), lambda i, k: (i, 0)),
        scratch_shapes=[pltpu.VMEM((tile_m, f_out), jnp.float32)],
        compiler_params=pltpu.CompilerParams(
            dimension_semantics=("parallel", "arbitrary")),
        cost_estimate=cost,
    )(a_hat, v, d_col, bias_row)


# ---------------------------------------------------------------------------
# Graph glue: self-loop-added adjacency (int8, row = destination) + D^{-1/2}.
# Scatter-add build stays in plain JAX; normalization is fused in-kernel.
# ---------------------------------------------------------------------------
def _build_graph(edge_index, num_nodes, n_pad):
    src = edge_index[0].astype(jnp.int32)
    dst = edge_index[1].astype(jnp.int32)
    diag = jnp.arange(num_nodes, dtype=jnp.int32)
    rows = jnp.concatenate([dst, diag])          # message flows src -> dst
    cols = jnp.concatenate([src, diag])          # self loops on real nodes only

    # Degree via 1-D scatter (no dense N_pad^2 row-sum). Padded rows: deg 0.
    deg = jnp.zeros((n_pad,), jnp.float32).at[rows].add(1.0)
    d_inv_sqrt = jnp.where(deg > 0.0, jax.lax.rsqrt(deg), 0.0)

    # Entries are small exact integer counts (duplicate edges accumulate,
    # matching the dense reference); int8 in HBM halves the kernel's A stream.
    a = jnp.zeros((n_pad, n_pad), jnp.int32).at[rows, cols].add(1)
    return a.astype(jnp.int8), d_inv_sqrt.reshape(n_pad, 1)


# ---------------------------------------------------------------------------
# Forward pass (jitted so padding / graph build fuse into one XLA program).
# ---------------------------------------------------------------------------
@jax.jit
def _olga_forward(x, edge_index, w1, b1, w2, b2):
    n, f_in = x.shape
    h0 = w1.shape[1]
    h1 = w2.shape[1]

    f_in_p = _round_up(f_in, _LANE)
    h0_p = _round_up(h0, _LANE)
    h1_p = _round_up(h1, _LANE)
    n_pad, tile_m, tile_k = _choose_tiling(n)

    # Zero-pad operands to lane-dense / tile-divisible shapes.
    x_p = jnp.zeros((n_pad, f_in_p), jnp.float32).at[:n, :f_in].set(x)
    w1_p = jnp.zeros((f_in_p, h0_p), jnp.float32).at[:f_in, :h0].set(w1)
    b1_p = jnp.zeros((1, h0_p), jnp.float32).at[0, :h0].set(b1)
    w2_p = jnp.zeros((h0_p, h1_p), jnp.float32).at[:h0, :h1].set(w2)
    b2_p = jnp.zeros((1, h1_p), jnp.float32).at[0, :h1].set(b2)

    a_hat, d_col = _build_graph(edge_index, n, n_pad)

    # Layer 1: tanh(D^-1/2 A_hat D^-1/2 (X W1) + b1).  Kept bf16: it is
    # immediately re-quantized to bf16 V by layer 2, so an f32 round trip
    # through HBM would be pure overhead.
    v1 = _xw_scale(x_p, w1_p, d_col, tile_m=tile_m)
    h1_full = _aggregate(a_hat, v1, d_col, b1_p,
                         tile_m=tile_m, tile_k=tile_k, out_dtype=jnp.bfloat16)

    # Layer 2: tanh(D^-1/2 A_hat D^-1/2 (H1 W2) + b2), final output f32.
    v2 = _xw_scale(h1_full, w2_p, d_col, tile_m=tile_m)
    h2_full = _aggregate(a_hat, v2, d_col, b2_p,
                         tile_m=tile_m, tile_k=tile_k, out_dtype=jnp.float32)

    return h2_full[:n, :h1]


class OLGA:
    """JAX/Pallas port of the PyTorch OLGA module (deterministic init)."""

    def __init__(self, input_len, hidden_lens, key):
        k1, k2 = jax.random.split(key, 2)

        def glorot(k, fan_in, fan_out):
            limit = jnp.sqrt(6.0 / (fan_in + fan_out))
            return jax.random.uniform(
                k, (fan_in, fan_out), jnp.float32, -limit, limit)

        # PyG GCNConv default: glorot weights, zero bias.
        self.input_len = int(input_len)
        self.hidden_lens = tuple(int(h) for h in hidden_lens)
        self.w1 = glorot(k1, input_len, self.hidden_lens[0])
        self.b1 = jnp.zeros((self.hidden_lens[0],), jnp.float32)
        self.w2 = glorot(k2, self.hidden_lens[0], self.hidden_lens[1])
        self.b2 = jnp.zeros((self.hidden_lens[1],), jnp.float32)

    def __call__(self, x, edge_index):
        return _olga_forward(x, edge_index, self.w1, self.b1,
                             self.w2, self.b2)


if __name__ == "__main__":
    key = jax.random.PRNGKey(0)
    k_x, k_params = jax.random.split(key)

    num_nodes = 8
    input_len = 4
    hidden_lens = [32, 16]

    # Node features (N, F_in).
    x = jax.random.normal(k_x, (num_nodes, input_len), jnp.float32)

    # Deterministic bidirectional ring graph: edge_index shape (2, 16).
    fwd_src = jnp.arange(num_nodes, dtype=jnp.int32)
    fwd_dst = (fwd_src + 1) % num_nodes
    edge_index = jnp.stack(
        [jnp.concatenate([fwd_src, fwd_dst]),
         jnp.concatenate([fwd_dst, fwd_src])],
        axis=0,
    )

    model = OLGA(input_len, hidden_lens, k_params)
    out = jax.block_until_ready(model(x, edge_index))

    # Pure-JAX f32 reference (PyG gcn_norm semantics) for a sanity check.
    def reference(x, edge_index):
        n = x.shape[0]
        a = jnp.zeros((n, n), jnp.float32).at[edge_index[1], edge_index[0]].add(1.0)
        a = a + jnp.eye(n, dtype=jnp.float32)
        deg = a.sum(axis=1)
        dis = jnp.where(deg > 0.0, 1.0 / jnp.sqrt(deg), 0.0)
        a_n = dis[:, None] * a * dis[None, :]
        r1 = jnp.tanh(a_n @ (x @ model.w1) + model.b1)
        r2 = jnp.tanh(a_n @ (r1 @ model.w2) + model.b2)
        return r2

    ref = reference(x, edge_index)
    assert out.shape == (num_nodes, hidden_lens[1])
    assert jnp.all(jnp.isfinite(out))
    max_err = float(jnp.max(jnp.abs(out - ref)))
    assert max_err < 5e-2, f"max abs error vs reference: {max_err}"
    print("KERNEL_OK")
</pallas_src>

<mosaic_0001>
module attributes {stable_mosaic.version = 11 : i64} {
  func.func @_xw_scale_kernel(%arg0: i32, %arg1: memref<128x128xf32, #tpu.memory_space<vmem>>, %arg2: memref<128x128xf32, #tpu.memory_space<vmem>>, %arg3: memref<128x1xf32, #tpu.memory_space<vmem>>, %arg4: memref<128x128xbf16, #tpu.memory_space<vmem>>) attributes {dimension_semantics = [#tpu.dimension_semantics<parallel>], iteration_bounds = array<i64: 1>, scalar_prefetch = 0 : i64, scratch_operands = 0 : i64, tpu.core_type = #tpu.core_type<tc>, window_params = [{transform_indices = @transform_0, window_bounds = array<i64: 128, 128>}, {pipeline_mode = #tpu.pipeline_mode<synchronous>, transform_indices = @transform_1, window_bounds = array<i64: 128, 128>}, {transform_indices = @transform_2, window_bounds = array<i64: 128, 1>}, {transform_indices = @transform_3, window_bounds = array<i64: 128, 128>}]} {
    %c0 = arith.constant 0 : index
    %c0_0 = arith.constant 0 : index
    %0 = vector.load %arg1[%c0, %c0_0] : memref<128x128xf32, #tpu.memory_space<vmem>>, vector<128x128xf32>
    %c0_1 = arith.constant 0 : index
    %c0_2 = arith.constant 0 : index
    %1 = vector.load %arg2[%c0_1, %c0_2] : memref<128x128xf32, #tpu.memory_space<vmem>>, vector<128x128xf32>
    %cst = arith.constant dense<0.000000e+00> : vector<128x128xf32>
    %2 = tpu.matmul %0, %1, %cst {dimension_numbers = #tpu.dot_dimension_numbers<[1], [0], [0], [1], [0, 0, 1, 1], [], []>} : vector<128x128xf32>, vector<128x128xf32>, vector<128x128xf32> -> vector<128x128xf32>
    %c0_3 = arith.constant 0 : index
    %c0_4 = arith.constant 0 : index
    %3 = vector.load %arg3[%c0_3, %c0_4] : memref<128x1xf32, #tpu.memory_space<vmem>>, vector<128x1xf32>
    %4 = vector.broadcast %3 : vector<128x1xf32> to vector<128x128xf32>
    %5 = arith.mulf %4, %2 : vector<128x128xf32>
    %6 = arith.truncf %5 : vector<128x128xf32> to vector<128x128xbf16>
    %c0_5 = arith.constant 0 : index
    %c0_6 = arith.constant 0 : index
    %7 = vector.load %arg4[%c0_5, %c0_6] : memref<128x128xbf16, #tpu.memory_space<vmem>>, vector<128x128xbf16>
    tpu.vector_store %arg4[%c0_5, %c0_6], %6 {strides = array<i32>} : memref<128x128xbf16, #tpu.memory_space<vmem>>, vector<128x128xbf16>,
    return
  }
  func.func @transform_0(%arg0: i32) -> (i32, i32) {
    %c0_i32 = arith.constant 0 : i32
    %c0_i32_0 = arith.constant 0 : i32
    return %arg0, %c0_i32 : i32, i32
  }
  func.func @transform_1(%arg0: i32) -> (i32, i32) {
    %c0_i32 = arith.constant 0 : i32
    %c0_i32_0 = arith.constant 0 : i32
    %c0_i32_1 = arith.constant 0 : i32
    return %c0_i32, %c0_i32_0 : i32, i32
  }
  func.func @transform_2(%arg0: i32) -> (i32, i32) {
    %c0_i32 = arith.constant 0 : i32
    %c0_i32_0 = arith.constant 0 : i32
    return %arg0, %c0_i32 : i32, i32
  }
  func.func @transform_3(%arg0: i32) -> (i32, i32) {
    %c0_i32 = arith.constant 0 : i32
    %c0_i32_0 = arith.constant 0 : i32
    return %arg0, %c0_i32 : i32, i32
  }
}

module attributes {stable_mosaic.version = 11 : i64} {
  func.func @kernel(%arg0: i32, %arg1: i32, %arg2: memref<128x128xi8, #tpu.memory_space<vmem>>, %arg3: memref<128x128xbf16, #tpu.memory_space<vmem>>, %arg4: memref<128x1xf32, #tpu.memory_space<vmem>>, %arg5: memref<1x128xf32, #tpu.memory_space<vmem>>, %arg6: memref<128x128xbf16, #tpu.memory_space<vmem>>, %arg7: memref<128x128xf32, #tpu.memory_space<vmem>>) attributes {dimension_semantics = [#tpu.dimension_semantics<parallel>, #tpu.dimension_semantics<arbitrary>], iteration_bounds = array<i64: 1, 1>, scalar_prefetch = 0 : i64, scratch_operands = 1 : i64, tpu.core_type = #tpu.core_type<tc>, window_params = [{transform_indices = @transform_0, window_bounds = array<i64: 128, 128>}, {pipeline_mode = #tpu.pipeline_mode<synchronous>, transform_indices = @transform_1, window_bounds = array<i64: 128, 128>}, {transform_indices = @transform_2, window_bounds = array<i64: 128, 1>}, {pipeline_mode = #tpu.pipeline_mode<synchronous>, transform_indices = @transform_3, window_bounds = array<i64: 1, 128>}, {transform_indices = @transform_4, window_bounds = array<i64: 128, 128>}]} {
    %c0_i32 = arith.constant 0 : i32
    %0 = arith.cmpi eq, %arg1, %c0_i32 : i32
    %1 = arith.extui %0 : i1 to i32
    %c0_i32_0 = arith.constant 0 : i32
    %2 = arith.cmpi ne, %1, %c0_i32_0 : i32
    scf.if %2 {
      %cst_9 = arith.constant 0.000000e+00 : f32
      %16 = vector.broadcast %cst_9 : f32 to vector<128x128xf32>
      %c0_10 = arith.constant 0 : index
      %c0_11 = arith.constant 0 : index
      %17 = vector.load %arg7[%c0_10, %c0_11] : memref<128x128xf32, #tpu.memory_space<vmem>>, vector<128x128xf32>
      tpu.vector_store %arg7[%c0_10, %c0_11], %16 {strides = array<i32>} : memref<128x128xf32, #tpu.memory_space<vmem>>, vector<128x128xf32>,
    } else {
    }
    %c0 = arith.constant 0 : index
    %c0_1 = arith.constant 0 : index
    %3 = vector.load %arg2[%c0, %c0_1] : memref<128x128xi8, #tpu.memory_space<vmem>>, vector<128x128xi8>
    %4 = arith.sitofp %3 : vector<128x128xi8> to vector<128x128xbf16>
    %c128_i32 = arith.constant 128 : i32
    %5 = arith.muli %arg1, %c128_i32 : i32
    %6 = tpu.assume_multiple %5, 128 : i32
    %7 = arith.index_cast %6 : i32 to index
    %c0_2 = arith.constant 0 : index
    %8 = vector.load %arg3[%7, %c0_2] : memref<128x128xbf16, #tpu.memory_space<vmem>>, vector<128x128xbf16>
    %c0_3 = arith.constant 0 : index
    %c0_4 = arith.constant 0 : index
    %9 = vector.load %arg7[%c0_3, %c0_4] : memref<128x128xf32, #tpu.memory_space<vmem>>, vector<128x128xf32>
    %cst = arith.constant dense<0.000000e+00> : vector<128x128xf32>
    %10 = tpu.matmul %4, %8, %cst {dimension_numbers = #tpu.dot_dimension_numbers<[1], [0], [0], [1], [0, 0, 1, 1], [], []>} : vector<128x128xbf16>, vector<128x128xbf16>, vector<128x128xf32> -> vector<128x128xf32>
    %11 = arith.addf %9, %10 : vector<128x128xf32>
    %c0_5 = arith.constant 0 : index
    %c0_6 = arith.constant 0 : index
    %12 = vector.load %arg7[%c0_5, %c0_6] : memref<128x128xf32, #tpu.memory_space<vmem>>, vector<128x128xf32>
    tpu.vector_store %arg7[%c0_5, %c0_6], %11 {strides = array<i32>} : memref<128x128xf32, #tpu.memory_space<vmem>>, vector<128x128xf32>,
    %c0_i32_7 = arith.constant 0 : i32
    %13 = arith.cmpi eq, %arg1, %c0_i32_7 : i32
    %14 = arith.extui %13 : i1 to i32
    %c0_i32_8 = arith.constant 0 : i32
    %15 = arith.cmpi ne, %14, %c0_i32_8 : i32
    scf.if %15 {
      %c0_9 = arith.constant 0 : index
      %c0_10 = arith.constant 0 : index
      %16 = vector.load %arg4[%c0_9, %c0_10] : memref<128x1xf32, #tpu.memory_space<vmem>>, vector<128x1xf32>
      %c0_11 = arith.constant 0 : index
      %c0_12 = arith.constant 0 : index
      %17 = vector.load %arg7[%c0_11, %c0_12] : memref<128x128xf32, #tpu.memory_space<vmem>>, vector<128x128xf32>
      %18 = vector.broadcast %16 : vector<128x1xf32> to vector<128x128xf32>
      %19 = arith.mulf %18, %17 : vector<128x128xf32>
      %c0_13 = arith.constant 0 : index
      %c0_14 = arith.constant 0 : index
      %20 = vector.load %arg5[%c0_13, %c0_14] : memref<1x128xf32, #tpu.memory_space<vmem>>, vector<1x128xf32>
      %21 = vector.broadcast %20 : vector<1x128xf32> to vector<128x128xf32>
      %22 = arith.addf %19, %21 : vector<128x128xf32>
      %23 = math.tanh %22 : vector<128x128xf32>
      %24 = arith.truncf %23 : vector<128x128xf32> to vector<128x128xbf16>
      %c0_15 = arith.constant 0 : index
      %c0_16 = arith.constant 0 : index
      %25 = vector.load %arg6[%c0_15, %c0_16] : memref<128x128xbf16, #tpu.memory_space<vmem>>, vector<128x128xbf16>
      tpu.vector_store %arg6[%c0_15, %c0_16], %24 {strides = array<i32>} : memref<128x128xbf16, #tpu.memory_space<vmem>>, vector<128x128xbf16>,
    } else {
    }
    return
  }
  func.func @transform_0(%arg0: i32, %arg1: i32) -> (i32, i32) {
    %c0_i32 = arith.constant 0 : i32
    return %arg0, %arg1 : i32, i32
  }
  func.func @transform_1(%arg0: i32, %arg1: i32) -> (i32, i32) {
    %c0_i32 = arith.constant 0 : i32
    %c0_i32_0 = arith.constant 0 : i32
    %c0_i32_1 = arith.constant 0 : i32
    return %c0_i32, %c0_i32_0 : i32, i32
  }
  func.func @transform_2(%arg0: i32, %arg1: i32) -> (i32, i32) {
    %c0_i32 = arith.constant 0 : i32
    %c0_i32_0 = arith.constant 0 : i32
    return %arg0, %c0_i32 : i32, i32
  }
  func.func @transform_3(%arg0: i32, %arg1: i32) -> (i32, i32) {
    %c0_i32 = arith.constant 0 : i32
    %c0_i32_0 = arith.constant 0 : i32
    %c0_i32_1 = arith.constant 0 : i32
    return %c0_i32, %c0_i32_0 : i32, i32
  }
  func.func @transform_4(%arg0: i32, %arg1: i32) -> (i32, i32) {
    %c0_i32 = arith.constant 0 : i32
    %c0_i32_0 = arith.constant 0 : i32
    return %arg0, %c0_i32 : i32, i32
  }
}

module attributes {stable_mosaic.version = 11 : i64} {
  func.func @_xw_scale_kernel(%arg0: i32, %arg1: memref<128x128xbf16, #tpu.memory_space<vmem>>, %arg2: memref<128x128xf32, #tpu.memory_space<vmem>>, %arg3: memref<128x1xf32, #tpu.memory_space<vmem>>, %arg4: memref<128x128xbf16, #tpu.memory_space<vmem>>) attributes {dimension_semantics = [#tpu.dimension_semantics<parallel>], iteration_bounds = array<i64: 1>, scalar_prefetch = 0 : i64, scratch_operands = 0 : i64, tpu.core_type = #tpu.core_type<tc>, window_params = [{transform_indices = @transform_0, window_bounds = array<i64: 128, 128>}, {pipeline_mode = #tpu.pipeline_mode<synchronous>, transform_indices = @transform_1, window_bounds = array<i64: 128, 128>}, {transform_indices = @transform_2, window_bounds = array<i64: 128, 1>}, {transform_indices = @transform_3, window_bounds = array<i64: 128, 128>}]} {
    %c0 = arith.constant 0 : index
    %c0_0 = arith.constant 0 : index
    %0 = vector.load %arg1[%c0, %c0_0] : memref<128x128xbf16, #tpu.memory_space<vmem>>, vector<128x128xbf16>
    %1 = arith.extf %0 : vector<128x128xbf16> to vector<128x128xf32>
    %c0_1 = arith.constant 0 : index
    %c0_2 = arith.constant 0 : index
    %2 = vector.load %arg2[%c0_1, %c0_2] : memref<128x128xf32, #tpu.memory_space<vmem>>, vector<128x128xf32>
    %cst = arith.constant dense<0.000000e+00> : vector<128x128xf32>
    %3 = tpu.matmul %1, %2, %cst {dimension_numbers = #tpu.dot_dimension_numbers<[1], [0], [0], [1], [0, 0, 1, 1], [], []>} : vector<128x128xf32>, vector<128x128xf32>, vector<128x128xf32> -> vector<128x128xf32>
    %c0_3 = arith.constant 0 : index
    %c0_4 = arith.constant 0 : index
    %4 = vector.load %arg3[%c0_3, %c0_4] : memref<128x1xf32, #tpu.memory_space<vmem>>, vector<128x1xf32>
    %5 = vector.broadcast %4 : vector<128x1xf32> to vector<128x128xf32>
    %6 = arith.mulf %5, %3 : vector<128x128xf32>
    %7 = arith.truncf %6 : vector<128x128xf32> to vector<128x128xbf16>
    %c0_5 = arith.constant 0 : index
    %c0_6 = arith.constant 0 : index
    %8 = vector.load %arg4[%c0_5, %c0_6] : memref<128x128xbf16, #tpu.memory_space<vmem>>, vector<128x128xbf16>
    tpu.vector_store %arg4[%c0_5, %c0_6], %7 {strides = array<i32>} : memref<128x128xbf16, #tpu.memory_space<vmem>>, vector<128x128xbf16>,
    return
  }
  func.func @transform_0(%arg0: i32) -> (i32, i32) {
    %c0_i32 = arith.constant 0 : i32
    %c0_i32_0 = arith.constant 0 : i32
    return %arg0, %c0_i32 : i32, i32
  }
  func.func @transform_1(%arg0: i32) -> (i32, i32) {
    %c0_i32 = arith.constant 0 : i32
    %c0_i32_0 = arith.constant 0 : i32
    %c0_i32_1 = arith.constant 0 : i32
    return %c0_i32, %c0_i32_0 : i32, i32
  }
  func.func @transform_2(%arg0: i32) -> (i32, i32) {
    %c0_i32 = arith.constant 0 : i32
    %c0_i32_0 = arith.constant 0 : i32
    return %arg0, %c0_i32 : i32, i32
  }
  func.func @transform_3(%arg0: i32) -> (i32, i32) {
    %c0_i32 = arith.constant 0 : i32
    %c0_i32_0 = arith.constant 0 : i32
    return %arg0, %c0_i32 : i32, i32
  }
}

module attributes {stable_mosaic.version = 11 : i64} {
  func.func @kernel(%arg0: i32, %arg1: i32, %arg2: memref<128x128xi8, #tpu.memory_space<vmem>>, %arg3: memref<128x128xbf16, #tpu.memory_space<vmem>>, %arg4: memref<128x1xf32, #tpu.memory_space<vmem>>, %arg5: memref<1x128xf32, #tpu.memory_space<vmem>>, %arg6: memref<128x128xf32, #tpu.memory_space<vmem>>, %arg7: memref<128x128xf32, #tpu.memory_space<vmem>>) attributes {dimension_semantics = [#tpu.dimension_semantics<parallel>, #tpu.dimension_semantics<arbitrary>], iteration_bounds = array<i64: 1, 1>, scalar_prefetch = 0 : i64, scratch_operands = 1 : i64, tpu.core_type = #tpu.core_type<tc>, window_params = [{transform_indices = @transform_0, window_bounds = array<i64: 128, 128>}, {pipeline_mode = #tpu.pipeline_mode<synchronous>, transform_indices = @transform_1, window_bounds = array<i64: 128, 128>}, {transform_indices = @transform_2, window_bounds = array<i64: 128, 1>}, {pipeline_mode = #tpu.pipeline_mode<synchronous>, transform_indices = @transform_3, window_bounds = array<i64: 1, 128>}, {transform_indices = @transform_4, window_bounds = array<i64: 128, 128>}]} {
    %c0_i32 = arith.constant 0 : i32
    %0 = arith.cmpi eq, %arg1, %c0_i32 : i32
    %1 = arith.extui %0 : i1 to i32
    %c0_i32_0 = arith.constant 0 : i32
    %2 = arith.cmpi ne, %1, %c0_i32_0 : i32
    scf.if %2 {
      %cst_9 = arith.constant 0.000000e+00 : f32
      %16 = vector.broadcast %cst_9 : f32 to vector<128x128xf32>
      %c0_10 = arith.constant 0 : index
      %c0_11 = arith.constant 0 : index
      %17 = vector.load %arg7[%c0_10, %c0_11] : memref<128x128xf32, #tpu.memory_space<vmem>>, vector<128x128xf32>
      tpu.vector_store %arg7[%c0_10, %c0_11], %16 {strides = array<i32>} : memref<128x128xf32, #tpu.memory_space<vmem>>, vector<128x128xf32>,
    } else {
    }
    %c0 = arith.constant 0 : index
    %c0_1 = arith.constant 0 : index
    %3 = vector.load %arg2[%c0, %c0_1] : memref<128x128xi8, #tpu.memory_space<vmem>>, vector<128x128xi8>
    %4 = arith.sitofp %3 : vector<128x128xi8> to vector<128x128xbf16>
    %c128_i32 = arith.constant 128 : i32
    %5 = arith.muli %arg1, %c128_i32 : i32
    %6 = tpu.assume_multiple %5, 128 : i32
    %7 = arith.index_cast %6 : i32 to index
    %c0_2 = arith.constant 0 : index
    %8 = vector.load %arg3[%7, %c0_2] : memref<128x128xbf16, #tpu.memory_space<vmem>>, vector<128x128xbf16>
    %c0_3 = arith.constant 0 : index
    %c0_4 = arith.constant 0 : index
    %9 = vector.load %arg7[%c0_3, %c0_4] : memref<128x128xf32, #tpu.memory_space<vmem>>, vector<128x128xf32>
    %cst = arith.constant dense<0.000000e+00> : vector<128x128xf32>
    %10 = tpu.matmul %4, %8, %cst {dimension_numbers = #tpu.dot_dimension_numbers<[1], [0], [0], [1], [0, 0, 1, 1], [], []>} : vector<128x128xbf16>, vector<128x128xbf16>, vector<128x128xf32> -> vector<128x128xf32>
    %11 = arith.addf %9, %10 : vector<128x128xf32>
    %c0_5 = arith.constant 0 : index
    %c0_6 = arith.constant 0 : index
    %12 = vector.load %arg7[%c0_5, %c0_6] : memref<128x128xf32, #tpu.memory_space<vmem>>, vector<128x128xf32>
    tpu.vector_store %arg7[%c0_5, %c0_6], %11 {strides = array<i32>} : memref<128x128xf32, #tpu.memory_space<vmem>>, vector<128x128xf32>,
    %c0_i32_7 = arith.constant 0 : i32
    %13 = arith.cmpi eq, %arg1, %c0_i32_7 : i32
    %14 = arith.extui %13 : i1 to i32
    %c0_i32_8 = arith.constant 0 : i32
    %15 = arith.cmpi ne, %14, %c0_i32_8 : i32
    scf.if %15 {
      %c0_9 = arith.constant 0 : index
      %c0_10 = arith.constant 0 : index
      %16 = vector.load %arg4[%c0_9, %c0_10] : memref<128x1xf32, #tpu.memory_space<vmem>>, vector<128x1xf32>
      %c0_11 = arith.constant 0 : index
      %c0_12 = arith.constant 0 : index
      %17 = vector.load %arg7[%c0_11, %c0_12] : memref<128x128xf32, #tpu.memory_space<vmem>>, vector<128x128xf32>
      %18 = vector.broadcast %16 : vector<128x1xf32> to vector<128x128xf32>
      %19 = arith.mulf %18, %17 : vector<128x128xf32>
      %c0_13 = arith.constant 0 : index
      %c0_14 = arith.constant 0 : index
      %20 = vector.load %arg5[%c0_13, %c0_14] : memref<1x128xf32, #tpu.memory_space<vmem>>, vector<1x128xf32>
      %21 = vector.broadcast %20 : vector<1x128xf32> to vector<128x128xf32>
      %22 = arith.addf %19, %21 : vector<128x128xf32>
      %23 = math.tanh %22 : vector<128x128xf32>
      %c0_15 = arith.constant 0 : index
      %c0_16 = arith.constant 0 : index
      %24 = vector.load %arg6[%c0_15, %c0_16] : memref<128x128xf32, #tpu.memory_space<vmem>>, vector<128x128xf32>
      tpu.vector_store %arg6[%c0_15, %c0_16], %23 {strides = array<i32>} : memref<128x128xf32, #tpu.memory_space<vmem>>, vector<128x128xf32>,
    } else {
    }
    return
  }
  func.func @transform_0(%arg0: i32, %arg1: i32) -> (i32, i32) {
    %c0_i32 = arith.constant 0 : i32
    return %arg0, %arg1 : i32, i32
  }
  func.func @transform_1(%arg0: i32, %arg1: i32) -> (i32, i32) {
    %c0_i32 = arith.constant 0 : i32
    %c0_i32_0 = arith.constant 0 : i32
    %c0_i32_1 = arith.constant 0 : i32
    return %c0_i32, %c0_i32_0 : i32, i32
  }
  func.func @transform_2(%arg0: i32, %arg1: i32) -> (i32, i32) {
    %c0_i32 = arith.constant 0 : i32
    %c0_i32_0 = arith.constant 0 : i32
    return %arg0, %c0_i32 : i32, i32
  }
  func.func @transform_3(%arg0: i32, %arg1: i32) -> (i32, i32) {
    %c0_i32 = arith.constant 0 : i32
    %c0_i32_0 = arith.constant 0 : i32
    %c0_i32_1 = arith.constant 0 : i32
    return %c0_i32, %c0_i32_0 : i32, i32
  }
  func.func @transform_4(%arg0: i32, %arg1: i32) -> (i32, i32) {
    %c0_i32 = arith.constant 0 : i32
    %c0_i32_0 = arith.constant 0 : i32
    return %arg0, %c0_i32 : i32, i32
  }
}

</mosaic_0001>

<bundles_post_ra>
// kernel: _olga_forward.5
= control target key start
LH: loop header
LB: loop body
LE: loop exit
PB: predicated region body
PF: predicated region fallthrough
CT: control target
= control target key end

     0   :  { %v715_v1 = vmov 0   ;;  %s881_s1 = inlined_call_operand.vmem [shape: bf16[128,128], index: 1, kind: input, shape index: {}]   ;;  %s882_s0 = inlined_call_operand.vmem [shape: s8[128,128], index: 0, kind: input, shape index: {}]   ;;  %s883_s2 = inlined_call_operand.vmem [shape: f32[128,1], index: 2, kind: input, shape index: {}]   ;;  %s884_s3 = inlined_call_operand.vmem [shape: f32[1,128], index: 3, kind: input, shape index: {}]   ;;  %s885_s4 = inlined_call_operand.vmem [shape: bf16[128,128], index: 4, kind: output, shape index: {}]  }
   0x1   :  { %v675_v0 = vld [vmem:[%s881_s1] sm:$0xff]   ;;  %674 = vset.pattern.permute.xlu1 %v715_v1  ;;  %673 = vset.pattern.permute.xlu0 %v715_v1  ;;  %v676_v2 = vld [vmem:[%s881_s1 + $0x8] sm:$0xff]   ;;  %v677_v3 = vld [vmem:[%s881_s1 + $0x10] sm:$0xff]  }
   0x2   :  { %624 = vmatprep.subr.bf16.mxu0 %v675_v0  ;;  %656 = vmatprep.subr.bf16.mxu1 %v675_v0  ;;  %v678_v4 = vld [vmem:[%s881_s1 + $0x18] sm:$0xff]   ;;  %v756_v5 = vld [vmem:[%s882_s0] sm:$0xff]  ;;  %v761_v6 = vld [vmem:[%s882_s0 + $0x10] sm:$0xff] }
   0x3   :  { %625 = vmatpush3.bf16.msra.mxu0 %v675_v0  ;;  %664 = vmatpush3.bf16.msra.mxu1 %v675_v0  ;;  %v42_v7 = vunpack.c.l.s8.bf16 %v756_v5  ;;  %v46_v8 = vunpack.c.l.s8.bf16 %v761_v6  ;;  %v269_v9 = vld [vmem:[%s883_s2 + $0x10] sm:$0xff]  ;;  %v267_v10 = vld [vmem:[%s883_s2] sm:$0xff]  ;;  %v270_v11 = vld [vmem:[%s883_s2 + $0x18] sm:$0xff]  ;;  %v43_v27 = vunpack.c.h.s8.bf16 %v756_v5  ;;  %v47_v28 = vunpack.c.h.s8.bf16 %v761_v6 }
   0x4   :  { %626 = vmatprep.subr.bf16.mxu0 %v676_v2  ;;  %657 = vmatprep.subr.bf16.mxu1 %v676_v2  ;;  %v268_v12 = vld [vmem:[%s883_s2 + $0x8] sm:$0xff]  ;;  %v679_v13 = vld [vmem:[%s881_s1 + $0x20] sm:$0xff]   ;;  %v274_v17 = vld [vmem:[%s883_s2 + $0x38] sm:$0xff] }
   0x5   :  { %311 = vperm.xlu1 %674, %v269_v9   ;;  %301 = vperm.xlu0 %673, %v267_v10   ;;  %v272_v14 = vld [vmem:[%s883_s2 + $0x28] sm:$0xff]  ;;  %v271_v15 = vld [vmem:[%s883_s2 + $0x20] sm:$0xff]  ;;  %v273_v18 = vld [vmem:[%s883_s2 + $0x30] sm:$0xff] }
   0x6   :  { %640 = vmatprep.mubr.bf16.mxu0 %v42_v7  ;;  %648 = vmatprep.mubr.bf16.mxu1 %v46_v8  ;;  %v680_v16 = vld [vmem:[%s881_s1 + $0x28] sm:$0xff]   ;;  %v681_v19 = vld [vmem:[%s881_s1 + $0x30] sm:$0xff]   ;;  %v275_v21 = vld [vmem:[%s883_s2 + $0x40] sm:$0xff] }
   0x7   :  { %627 = vmatpush3.bf16.msra.mxu0 %v676_v2  ;;  %665 = vmatpush3.bf16.msra.mxu1 %v676_v2  ;;  %v276_v20 = vld [vmem:[%s883_s2 + $0x48] sm:$0xff]  ;;  %v682_v22 = vld [vmem:[%s881_s1 + $0x38] sm:$0xff]   ;;  %v277_v24 = vld [vmem:[%s883_s2 + $0x50] sm:$0xff] }
   0x8   :  { %628 = vmatprep.subr.bf16.mxu0 %v677_v3  ;;  %658 = vmatprep.subr.bf16.mxu1 %v677_v3  ;;  %v278_v23 = vld [vmem:[%s883_s2 + $0x58] sm:$0xff]  ;;  %v39_v25 = vld [vmem:[%s882_s0 + $0x8] sm:$0xff]  ;;  %v279_v32 = vld [vmem:[%s883_s2 + $0x60] sm:$0xff] }
   0x9   :  { %316 = vperm.xlu1 %674, %v270_v11   ;;  %306 = vperm.xlu0 %673, %v268_v12   ;;  %v41_v26 = vld [vmem:[%s882_s0 + $0x18] sm:$0xff]  ;;  %v44_v29 = vunpack.c.l.s8.bf16 %v39_v25  ;;  %v280_v31 = vld [vmem:[%s883_s2 + $0x68] sm:$0xff]  ;;  %v281_v34 = vld [vmem:[%s883_s2 + $0x70] sm:$0xff]  ;;  %v45_v35 = vunpack.c.h.s8.bf16 %v39_v25 }
   0xa   :  { %v48_v30 = vunpack.c.l.s8.bf16 %v41_v26  ;;  %v282_v33 = vld [vmem:[%s883_s2 + $0x78] sm:$0xff]  ;;  %v49_v36 = vunpack.c.h.s8.bf16 %v41_v26  ;;  %v838_v52 = vld [vmem:[%s884_s3] ss:$0 sm:$0xff] }
   0xb   :  { %629 = vmatpush3.bf16.msra.mxu0 %v677_v3  ;;  %666 = vmatpush3.bf16.msra.mxu1 %v677_v3 }
   0xc   :  { %630 = vmatprep.subr.bf16.mxu0 %v678_v4  ;;  %659 = vmatprep.subr.bf16.mxu1 %v678_v4 }
   0xd   :  { %326 = vperm.xlu1 %674, %v272_v14   ;;  %321 = vperm.xlu0 %673, %v271_v15  }
   0xf   :  { %631 = vmatpush3.bf16.msra.mxu0 %v678_v4  ;;  %667 = vmatpush3.bf16.msra.mxu1 %v678_v4 }
  0x10   :  { %632 = vmatprep.subr.bf16.mxu0 %v679_v13  ;;  %660 = vmatprep.subr.bf16.mxu1 %v679_v13 }
  0x11   :  { %336 = vperm.xlu1 %674, %v274_v17   ;;  %331 = vperm.xlu0 %673, %v273_v18  }
  0x13   :  { %633 = vmatpush3.bf16.msra.mxu0 %v679_v13  ;;  %668 = vmatpush3.bf16.msra.mxu1 %v679_v13 }
  0x14   :  { %634 = vmatprep.subr.bf16.mxu0 %v680_v16  ;;  %661 = vmatprep.subr.bf16.mxu1 %v680_v16 }
  0x15   :  { %346 = vperm.xlu1 %674, %v276_v20   ;;  %341 = vperm.xlu0 %673, %v275_v21  }
  0x17   :  { %635 = vmatpush3.bf16.msra.mxu0 %v680_v16  ;;  %669 = vmatpush3.bf16.msra.mxu1 %v680_v16 }
  0x18   :  { %636 = vmatprep.subr.bf16.mxu0 %v681_v19  ;;  %662 = vmatprep.subr.bf16.mxu1 %v681_v19 }
  0x19   :  { %356 = vperm.xlu1 %674, %v278_v23   ;;  %351 = vperm.xlu0 %673, %v277_v24  }
  0x1b   :  { %637 = vmatpush3.bf16.msra.mxu0 %v681_v19  ;;  %670 = vmatpush3.bf16.msra.mxu1 %v681_v19 }
  0x1c   :  { %638 = vmatprep.subr.bf16.mxu0 %v682_v22  ;;  %663 = vmatprep.subr.bf16.mxu1 %v682_v22 }
  0x1d   :  { %366 = vperm.xlu1 %674, %v280_v31   ;;  %361 = vperm.xlu0 %673, %v279_v32  }
  0x1f   :  { %639 = vmatpush3.bf16.msra.mxu0 %v682_v22  ;;  %671 = vmatpush3.bf16.msra.mxu1 %v682_v22 }
  0x21   :  { %376 = vperm.xlu1 %674, %v282_v33   ;;  %371 = vperm.xlu0 %673, %v281_v34  }
  0x22   :  { %641 = vmatmul.mubr.bf16.vlgmr.msra.gmra.mrb[0].mxu0 %v43_v27  ;;  %649 = vmatmul.mubr.bf16.vlgmr.msra.gmra.mrb[0].mxu1 %v47_v28 }
  0x23   :  { %644 = vmatprep.mubr.bf16.mxu0 %v44_v29  ;;  %652 = vmatprep.mubr.bf16.mxu1 %v48_v30 }
  0x2a   :  { %645 = vmatmul.mubr.bf16.gmra.mrb[4].mxu0 %v45_v35  ;;  %653 = vmatmul.mubr.bf16.gmra.mrb[4].mxu1 %v49_v36 }
  0x84   :  { %v312_v37 = vpop.permute.xlu1 %311  ;;  %v302_v38 = vpop.permute.xlu0 %301 }
  0x88   :  { %v317_v39 = vpop.permute.xlu1 %316  ;;  %v307_v40 = vpop.permute.xlu0 %306 }
  0x8c   :  { %v833_v41 = vpop.permute.xlu1 %326  ;;  %v322_v42 = vpop.permute.xlu0 %321 }
  0x90   :  { %v337_v43 = vpop.permute.xlu1 %336  ;;  %v332_v44 = vpop.permute.xlu0 %331 }
  0x94   :  { %v347_v45 = vpop.permute.xlu1 %346  ;;  %v342_v46 = vpop.permute.xlu0 %341 }
  0x98   :  { %v357_v47 = vpop.permute.xlu1 %356  ;;  %v352_v48 = vpop.permute.xlu0 %351 }
  0x9c   :  { %v367_v49 = vpop.permute.xlu1 %366  ;;  %v362_v50 = vpop.permute.xlu0 %361 }
  0xa0   :  { %v377_v10 = vpop.permute.xlu1 %376  ;;  %v372_v11 = vpop.permute.xlu0 %371 }
  0xf5   :  { %v642_v51 = vpop.f32.mrb[0].mxu0  ;;  %v650_v53 = vpop.f32.mrb[0].mxu1 }
  0xf6   :  { %v381_v54 = vmul.f32 %v642_v51, %v312_v37  ;;  %v389_v55 = vmul.f32 %v650_v53, %v352_v48  ;;  %v169_v56 = vpop.f32.mrb[1].mxu0  ;;  %v201_v57 = vpop.f32.mrb[1].mxu1 }
  0xf7   :  { %v379_v58 = vmul.f32 %v302_v38, %v169_v56  ;;  %v387_v59 = vmul.f32 %v342_v46, %v201_v57  ;;  %v643_v60 = vpop.f32.mrb[2].mxu0  ;;  %v651_v61 = vpop.f32.mrb[2].mxu1 }
  0xf8   :  { %v404_v62 = vadd.f32 %v838_v52, %v381_v54  ;;  %v412_v63 = vadd.f32 %v838_v52, %v389_v55  ;;  %v382_v0 = vmul.f32 %v643_v60, %v317_v39  ;;  %v390_v1 = vmul.f32 %v651_v61, %v357_v47  ;;  %v172_v2 = vpop.f32.mrb[3].mxu0  ;;  %v204_v3 = vpop.f32.mrb[3].mxu1 }
  0xf9   :  { %v402_v4 = vadd.f32 %v838_v52, %v379_v58  ;;  %v410_v5 = vadd.f32 %v838_v52, %v387_v59  ;;  %v380_v6 = vmul.f32 %v307_v40, %v172_v2  ;;  %v388_v7 = vmul.f32 %v347_v45, %v204_v3 }
  0xfa   :  { %683 = vtanh.f32 %v404_v62  ;;  %v405_v8 = vadd.f32 %v838_v52, %v382_v0  ;;  %v413_v9 = vadd.f32 %v838_v52, %v390_v1 }
  0xfb   :  { %685 = vtanh.f32 %v412_v63  ;;  %v403_v12 = vadd.f32 %v838_v52, %v380_v6  ;;  %v411_v13 = vadd.f32 %v838_v52, %v388_v7 }
  0xfc   :  { %687 = vtanh.f32 %v402_v4 }
  0xfd   :  { %689 = vtanh.f32 %v410_v5  ;;  %v646_v14 = vpop.f32.mrb[4].mxu0  ;;  %v654_v15 = vpop.f32.mrb[4].mxu1 }
  0xfe   :  { %691 = vtanh.f32 %v405_v8  ;;  %v385_v16 = vmul.f32 %v646_v14, %v332_v44  ;;  %v393_v17 = vmul.f32 %v654_v15, %v372_v11  ;;  %v185_v18 = vpop.f32.mrb[5].mxu0  ;;  %v217_v19 = vpop.f32.mrb[5].mxu1 }
  0xff   :  { %693 = vtanh.f32 %v413_v9  ;;  %v383_v20 = vmul.f32 %v322_v42, %v185_v18  ;;  %v391_v21 = vmul.f32 %v362_v50, %v217_v19  ;;  %v647_v22 = vpop.f32.mrb[6].mxu0  ;;  %v655_v23 = vpop.f32.mrb[6].mxu1 }
 0x100   :  { %695 = vtanh.f32 %v403_v12  ;;  %v408_v24 = vadd.f32 %v838_v52, %v385_v16  ;;  %v416_v25 = vadd.f32 %v838_v52, %v393_v17  ;;  %v386_v26 = vmul.f32 %v647_v22, %v337_v43  ;;  %v188_v27 = vpop.f32.mrb[7].mxu0  ;;  %v220_v28 = vpop.f32.mrb[7].mxu1 }
 0x101   :  { %697 = vtanh.f32 %v411_v13  ;;  %v406_v29 = vadd.f32 %v838_v52, %v383_v20  ;;  %v414_v30 = vadd.f32 %v838_v52, %v391_v21  ;;  %v394_v31 = vmul.f32 %v655_v23, %v377_v10 }
 0x102   :  { %699 = vtanh.f32 %v408_v24  ;;  %v409_v32 = vadd.f32 %v838_v52, %v386_v26  ;;  %v384_v33 = vmul.f32 %v833_v41, %v188_v27  ;;  %v392_v34 = vmul.f32 %v367_v49, %v220_v28 }
 0x103   :  { %701 = vtanh.f32 %v416_v25  ;;  %v417_v35 = vadd.f32 %v838_v52, %v394_v31 }
 0x104   :  { %v684_v36 = vpop.eup %683  ;;  %703 = vtanh.f32 %v406_v29  ;;  %v407_v37 = vadd.f32 %v838_v52, %v384_v33  ;;  %v415_v39 = vadd.f32 %v838_v52, %v392_v34 }
 0x105   :  { %v686_v38 = vpop.eup %685  ;;  %705 = vtanh.f32 %v414_v30 }
 0x106   :  { %v688_v40 = vpop.eup %687  ;;  %707 = vtanh.f32 %v409_v32 }
 0x107   :  { %v690_v42 = vpop.eup %689  ;;  %709 = vtanh.f32 %v417_v35 }
 0x108   :  { %v692_v43 = vpop.eup %691  ;;  %711 = vtanh.f32 %v407_v37 }
 0x109   :  { %v694_v44 = vpop.eup %693  ;;  %v569_v41 = vpack.c.bf16 %v692_v43, %v684_v36  ;;  %713 = vtanh.f32 %v415_v39 }
 0x10a   :  { %v696_v45 = vpop.eup %695  ;;  %v589_v46 = vpack.c.bf16 %v694_v44, %v686_v38 }
 0x10b   :  { %v698_v47 = vpop.eup %697  ;;  %601 = vst [vmem:[%s885_s4 + $0x8] sm:$0xff] %v569_v41   ;;  %v564_v48 = vpack.c.bf16 %v696_v45, %v688_v40 }
 0x10c   :  { %v700_v49 = vpop.eup %699  ;;  %605 = vst [vmem:[%s885_s4 + $0x28] sm:$0xff] %v589_v46   ;;  %v584_v50 = vpack.c.bf16 %v698_v47, %v690_v42 }
 0x10d   :  { %v702_v51 = vpop.eup %701  ;;  %565 = vst [vmem:[%s885_s4] sm:$0xff] %v564_v48  }
 0x10e   :  { %v704_v52 = vpop.eup %703  ;;  %604 = vst [vmem:[%s885_s4 + $0x20] sm:$0xff] %v584_v50  }
 0x10f   :  { %v706_v53 = vpop.eup %705 }
 0x110   :  { %v708_v54 = vpop.eup %707 }
 0x111   :  { %v710_v55 = vpop.eup %709  ;;  %v579_v56 = vpack.c.bf16 %v708_v54, %v700_v49 }
 0x112   :  { %v712_v57 = vpop.eup %711  ;;  %v599_v58 = vpack.c.bf16 %v710_v55, %v702_v51 }
 0x113   :  { %v714_v59 = vpop.eup %713  ;;  %603 = vst [vmem:[%s885_s4 + $0x18] sm:$0xff] %v579_v56   ;;  %v574_v60 = vpack.c.bf16 %v712_v57, %v704_v52 }
 0x114   :  { %607 = vst [vmem:[%s885_s4 + $0x38] sm:$0xff] %v599_v58   ;;  %v594_v61 = vpack.c.bf16 %v714_v59, %v706_v53 }
 0x115   :  { %602 = vst [vmem:[%s885_s4 + $0x10] sm:$0xff] %v574_v60  }
 0x116   :  { %606 = vst [vmem:[%s885_s4 + $0x30] sm:$0xff] %v594_v61  }

// kernel: _olga_forward.6
= control target key start
LH: loop header
LB: loop body
LE: loop exit
PB: predicated region body
PF: predicated region fallthrough
CT: control target
= control target key end

     0   :  { %v660_v3 = vmov 0   ;;  %s833_s1 = inlined_call_operand.vmem [shape: f32[128,128], index: 1, kind: input, shape index: {}]   ;;  %s834_s0 = inlined_call_operand.vmem [shape: bf16[128,128], index: 0, kind: input, shape index: {}]   ;;  %s835_s2 = inlined_call_operand.vmem [shape: f32[128,1], index: 2, kind: input, shape index: {}]   ;;  %s836_s3 = inlined_call_operand.vmem [shape: bf16[128,128], index: 3, kind: output, shape index: {}]  }
   0x1   :  { %v46_v0 = vld [vmem:[%s833_s1] sm:$0xff]  ;;  %v47_v1 = vld [vmem:[%s833_s1 + $0x8] sm:$0xff]  ;;  %v48_v2 = vld [vmem:[%s833_s1 + $0x10] sm:$0xff]  ;;  %659 = vset.pattern.permute.xlu1 %v660_v3  ;;  %658 = vset.pattern.permute.xlu0 %v660_v3 }
   0x2   :  { %v609_v4 = vpack.c.bf16 %v47_v1, %v46_v0  ;;  %v49_v5 = vld [vmem:[%s833_s1 + $0x18] sm:$0xff]  ;;  %v50_v7 = vld [vmem:[%s833_s1 + $0x20] sm:$0xff]  ;;  %v51_v8 = vld [vmem:[%s833_s1 + $0x28] sm:$0xff] }
   0x3   :  { %v613_v6 = vpack.c.bf16 %v49_v5, %v48_v2  ;;  %v617_v9 = vpack.c.bf16 %v51_v8, %v50_v7  ;;  %v702_v10 = vld [vmem:[%s834_s0] sm:$0xff]   ;;  %v52_v12 = vld [vmem:[%s833_s1 + $0x30] sm:$0xff]  ;;  %v53_v13 = vld [vmem:[%s833_s1 + $0x38] sm:$0xff] }
   0x4   :  { %610 = vmatprep.subr.bf16.mxu0 %v609_v4  ;;  %641 = vmatprep.subr.bf16.mxu1 %v609_v4  ;;  %v707_v11 = vld [vmem:[%s834_s0 + $0x20] sm:$0xff]   ;;  %v437_v14 = vunpack.c.l.bf16 %v702_v10  ;;  %v209_v16 = vld [vmem:[%s835_s2 + $0x10] sm:$0xff]  ;;  %v621_v18 = vpack.c.bf16 %v53_v13, %v52_v12  ;;  %v55_v20 = vld [vmem:[%s833_s1 + $0x48] sm:$0xff]  ;;  %v438_v43 = vunpack.c.h.bf16 %v702_v10 }
   0x5   :  { %612 = vmatpush3.bf16.msra.mxu0 %v609_v4  ;;  %649 = vmatpush3.bf16.msra.mxu1 %v609_v4  ;;  %v453_v15 = vunpack.c.l.bf16 %v707_v11  ;;  %v207_v17 = vld [vmem:[%s835_s2] sm:$0xff]  ;;  %v210_v21 = vld [vmem:[%s835_s2 + $0x18] sm:$0xff]  ;;  %v208_v22 = vld [vmem:[%s835_s2 + $0x8] sm:$0xff]  ;;  %v454_v44 = vunpack.c.h.bf16 %v707_v11 }
   0x6   :  { %614 = vmatprep.subr.bf16.mxu0 %v613_v6  ;;  %642 = vmatprep.subr.bf16.mxu1 %v613_v6  ;;  %v54_v19 = vld [vmem:[%s833_s1 + $0x40] sm:$0xff]  ;;  %v56_v24 = vld [vmem:[%s833_s1 + $0x50] sm:$0xff]  ;;  %v57_v25 = vld [vmem:[%s833_s1 + $0x58] sm:$0xff] }
   0x7   :  { %585 = vmatprep.mubr.f32.mxu0 %v437_v14  ;;  %597 = vmatprep.mubr.f32.mxu1 %v453_v15  ;;  %v625_v23 = vpack.c.bf16 %v55_v20, %v54_v19  ;;  %v212_v26 = vld [vmem:[%s835_s2 + $0x28] sm:$0xff]  ;;  %v211_v27 = vld [vmem:[%s835_s2 + $0x20] sm:$0xff]  ;;  %v629_v28 = vpack.c.bf16 %v57_v25, %v56_v24  ;;  %v214_v31 = vld [vmem:[%s835_s2 + $0x38] sm:$0xff] }
   0x8   :  { %235 = vperm.xlu1 %659, %v209_v16   ;;  %225 = vperm.xlu0 %658, %v207_v17   ;;  %v58_v29 = vld [vmem:[%s833_s1 + $0x60] sm:$0xff]  ;;  %v59_v30 = vld [vmem:[%s833_s1 + $0x68] sm:$0xff]  ;;  %v213_v32 = vld [vmem:[%s835_s2 + $0x30] sm:$0xff] }
   0x9   :  { %616 = vmatpush3.bf16.msra.mxu0 %v613_v6  ;;  %650 = vmatpush3.bf16.msra.mxu1 %v613_v6  ;;  %v633_v33 = vpack.c.bf16 %v59_v30, %v58_v29  ;;  %v60_v34 = vld [vmem:[%s833_s1 + $0x70] sm:$0xff]  ;;  %v61_v35 = vld [vmem:[%s833_s1 + $0x78] sm:$0xff]  ;;  %v216_v36 = vld [vmem:[%s835_s2 + $0x48] sm:$0xff] }
   0xa   :  { %618 = vmatprep.subr.bf16.mxu0 %v617_v9  ;;  %643 = vmatprep.subr.bf16.mxu1 %v617_v9  ;;  %v215_v37 = vld [vmem:[%s835_s2 + $0x40] sm:$0xff]  ;;  %v637_v38 = vpack.c.bf16 %v61_v35, %v60_v34  ;;  %v218_v39 = vld [vmem:[%s835_s2 + $0x58] sm:$0xff]  ;;  %v217_v40 = vld [vmem:[%s835_s2 + $0x50] sm:$0xff] }
   0xb   :  { %v507_v41 = vld [vmem:[%s834_s0 + $0x8] sm:$0xff]   ;;  %v508_v47 = vld [vmem:[%s834_s0 + $0x10] sm:$0xff]   ;;  %v219_v50 = vld [vmem:[%s835_s2 + $0x60] sm:$0xff] }
   0xc   :  { %240 = vperm.xlu1 %659, %v210_v21   ;;  %230 = vperm.xlu0 %658, %v208_v22   ;;  %v511_v42 = vld [vmem:[%s834_s0 + $0x28] sm:$0xff]   ;;  %v441_v45 = vunpack.c.l.bf16 %v507_v41  ;;  %v512_v48 = vld [vmem:[%s834_s0 + $0x30] sm:$0xff]   ;;  %v442_v51 = vunpack.c.h.bf16 %v507_v41  ;;  %v445_v53 = vunpack.c.l.bf16 %v508_v47  ;;  %v509_v55 = vld [vmem:[%s834_s0 + $0x18] sm:$0xff]   ;;  %v446_v59 = vunpack.c.h.bf16 %v508_v47 }
   0xd   :  { %620 = vmatpush3.bf16.msra.mxu0 %v617_v9  ;;  %651 = vmatpush3.bf16.msra.mxu1 %v617_v9  ;;  %v457_v46 = vunpack.c.l.bf16 %v511_v42  ;;  %v220_v49 = vld [vmem:[%s835_s2 + $0x68] sm:$0xff]  ;;  %v458_v52 = vunpack.c.h.bf16 %v511_v42  ;;  %v461_v54 = vunpack.c.l.bf16 %v512_v48  ;;  %v513_v56 = vld [vmem:[%s834_s0 + $0x38] sm:$0xff]   ;;  %v221_v58 = vld [vmem:[%s835_s2 + $0x70] sm:$0xff]  ;;  %v462_v60 = vunpack.c.h.bf16 %v512_v48 }
   0xe   :  { %622 = vmatprep.subr.bf16.mxu0 %v621_v18  ;;  %644 = vmatprep.subr.bf16.mxu1 %v621_v18  ;;  %v222_v57 = vld [vmem:[%s835_s2 + $0x78] sm:$0xff]  ;;  %v449_v61 = vunpack.c.l.bf16 %v509_v55  ;;  %v465_v62 = vunpack.c.l.bf16 %v513_v56  ;;  %v450_v63 = vunpack.c.h.bf16 %v509_v55  ;;  %v466_v0 = vunpack.c.h.bf16 %v513_v56 }
  0x10   :  { %250 = vperm.xlu1 %659, %v212_v26   ;;  %245 = vperm.xlu0 %658, %v211_v27  }
  0x11   :  { %624 = vmatpush3.bf16.msra.mxu0 %v621_v18  ;;  %652 = vmatpush3.bf16.msra.mxu1 %v621_v18 }
  0x12   :  { %626 = vmatprep.subr.bf16.mxu0 %v625_v23  ;;  %645 = vmatprep.subr.bf16.mxu1 %v625_v23 }
  0x14   :  { %260 = vperm.xlu1 %659, %v214_v31   ;;  %255 = vperm.xlu0 %658, %v213_v32  }
  0x15   :  { %628 = vmatpush3.bf16.msra.mxu0 %v625_v23  ;;  %653 = vmatpush3.bf16.msra.mxu1 %v625_v23 }
  0x16   :  { %630 = vmatprep.subr.bf16.mxu0 %v629_v28  ;;  %646 = vmatprep.subr.bf16.mxu1 %v629_v28 }
  0x18   :  { %270 = vperm.xlu1 %659, %v216_v36   ;;  %265 = vperm.xlu0 %658, %v215_v37  }
  0x19   :  { %632 = vmatpush3.bf16.msra.mxu0 %v629_v28  ;;  %654 = vmatpush3.bf16.msra.mxu1 %v629_v28 }
  0x1a   :  { %634 = vmatprep.subr.bf16.mxu0 %v633_v33  ;;  %647 = vmatprep.subr.bf16.mxu1 %v633_v33 }
  0x1c   :  { %280 = vperm.xlu1 %659, %v218_v39   ;;  %275 = vperm.xlu0 %658, %v217_v40  }
  0x1d   :  { %636 = vmatpush3.bf16.msra.mxu0 %v633_v33  ;;  %655 = vmatpush3.bf16.msra.mxu1 %v633_v33 }
  0x1e   :  { %638 = vmatprep.subr.bf16.mxu0 %v637_v38  ;;  %648 = vmatprep.subr.bf16.mxu1 %v637_v38 }
  0x20   :  { %290 = vperm.xlu1 %659, %v220_v49   ;;  %285 = vperm.xlu0 %658, %v219_v50  }
  0x21   :  { %640 = vmatpush3.bf16.msra.mxu0 %v637_v38  ;;  %656 = vmatpush3.bf16.msra.mxu1 %v637_v38 }
  0x24   :  { %586 = vmatmul.mubr.f32.vlgmr.msra.gmra.mrb[0].mxu0 %v438_v43  ;;  %598 = vmatmul.mubr.f32.vlgmr.msra.gmra.mrb[0].mxu1 %v454_v44 }
  0x25   :  { %588 = vmatprep.mubr.f32.mxu0 %v441_v45  ;;  %600 = vmatprep.mubr.f32.mxu1 %v457_v46 }
  0x26   :  { %300 = vperm.xlu1 %659, %v222_v57   ;;  %295 = vperm.xlu0 %658, %v221_v58  }
  0x28   :  { %589 = vmatmul.mubr.f32.gmra.mrb[2].mxu0 %v442_v51  ;;  %601 = vmatmul.mubr.f32.gmra.mrb[2].mxu1 %v458_v52 }
  0x29   :  { %591 = vmatprep.mubr.f32.mxu0 %v445_v53  ;;  %603 = vmatprep.mubr.f32.mxu1 %v461_v54 }
  0x2c   :  { %592 = vmatmul.mubr.f32.gmra.mrb[4].mxu0 %v446_v59  ;;  %604 = vmatmul.mubr.f32.gmra.mrb[4].mxu1 %v462_v60 }
  0x2d   :  { %594 = vmatprep.mubr.f32.mxu0 %v449_v61  ;;  %606 = vmatprep.mubr.f32.mxu1 %v465_v62 }
  0x30   :  { %595 = vmatmul.mubr.f32.gmra.mrb[6].mxu0 %v450_v63  ;;  %607 = vmatmul.mubr.f32.gmra.mrb[6].mxu1 %v466_v0 }
  0x87   :  { %v236_v1 = vpop.permute.xlu1 %235  ;;  %v226_v2 = vpop.permute.xlu0 %225 }
  0x8b   :  { %v241_v3 = vpop.permute.xlu1 %240  ;;  %v231_v4 = vpop.permute.xlu0 %230 }
  0x8f   :  { %v251_v5 = vpop.permute.xlu1 %250  ;;  %v246_v6 = vpop.permute.xlu0 %245 }
  0x93   :  { %v261_v7 = vpop.permute.xlu1 %260  ;;  %v256_v8 = vpop.permute.xlu0 %255 }
  0x97   :  { %v271_v9 = vpop.permute.xlu1 %270  ;;  %v266_v10 = vpop.permute.xlu0 %265 }
  0x9b   :  { %v281_v11 = vpop.permute.xlu1 %280  ;;  %v276_v12 = vpop.permute.xlu0 %275 }
  0x9f   :  { %v291_v21 = vpop.permute.xlu1 %290  ;;  %v286_v22 = vpop.permute.xlu0 %285 }
  0xa5   :  { %v301_v43 = vpop.permute.xlu1 %300  ;;  %v296_v44 = vpop.permute.xlu0 %295 }
  0xf7   :  { %v587_v13 = vpop.f32.mrb[0].mxu0  ;;  %v599_v14 = vpop.f32.mrb[0].mxu1 }
  0xf8   :  { %v304_v15 = vmul.f32 %v587_v13, %v231_v4  ;;  %v312_v16 = vmul.f32 %v599_v14, %v271_v9  ;;  %v128_v17 = vpop.f32.mrb[1].mxu0  ;;  %v168_v18 = vpop.f32.mrb[1].mxu1 }
  0xf9   :  { %v303_v19 = vmul.f32 %v226_v2, %v128_v17  ;;  %v311_v20 = vmul.f32 %v266_v10, %v168_v18 }
  0xfb   :  { %v470_v23 = vpack.c.bf16 %v304_v15, %v303_v19  ;;  %v490_v24 = vpack.c.bf16 %v312_v16, %v311_v20  ;;  %v590_v25 = vpop.f32.mrb[2].mxu0  ;;  %v602_v26 = vpop.f32.mrb[2].mxu1 }
  0xfc   :  { %v306_v27 = vmul.f32 %v590_v25, %v241_v3  ;;  %v314_v28 = vmul.f32 %v602_v26, %v281_v11  ;;  %v138_v29 = vpop.f32.mrb[3].mxu0  ;;  %v178_v30 = vpop.f32.mrb[3].mxu1 }
  0xfd   :  { %471 = vst [vmem:[%s836_s3] sm:$0xff] %v470_v23   ;;  %517 = vst [vmem:[%s836_s3 + $0x20] sm:$0xff] %v490_v24   ;;  %v305_v31 = vmul.f32 %v236_v1, %v138_v29  ;;  %v313_v32 = vmul.f32 %v276_v12, %v178_v30 }
  0xff   :  { %v475_v33 = vpack.c.bf16 %v306_v27, %v305_v31  ;;  %v495_v34 = vpack.c.bf16 %v314_v28, %v313_v32  ;;  %v593_v35 = vpop.f32.mrb[4].mxu0  ;;  %v605_v36 = vpop.f32.mrb[4].mxu1 }
 0x100   :  { %v308_v37 = vmul.f32 %v593_v35, %v251_v5  ;;  %v316_v38 = vmul.f32 %v605_v36, %v291_v21  ;;  %v148_v39 = vpop.f32.mrb[5].mxu0  ;;  %v188_v40 = vpop.f32.mrb[5].mxu1 }
 0x101   :  { %514 = vst [vmem:[%s836_s3 + $0x8] sm:$0xff] %v475_v33   ;;  %518 = vst [vmem:[%s836_s3 + $0x28] sm:$0xff] %v495_v34   ;;  %v307_v41 = vmul.f32 %v246_v6, %v148_v39  ;;  %v315_v42 = vmul.f32 %v286_v22, %v188_v40 }
 0x103   :  { %v480_v45 = vpack.c.bf16 %v308_v37, %v307_v41  ;;  %v500_v46 = vpack.c.bf16 %v316_v38, %v315_v42  ;;  %v596_v47 = vpop.f32.mrb[6].mxu0  ;;  %v608_v48 = vpop.f32.mrb[6].mxu1 }
 0x104   :  { %v310_v49 = vmul.f32 %v596_v47, %v261_v7  ;;  %v318_v50 = vmul.f32 %v608_v48, %v301_v43  ;;  %v158_v51 = vpop.f32.mrb[7].mxu0  ;;  %v198_v52 = vpop.f32.mrb[7].mxu1 }
 0x105   :  { %515 = vst [vmem:[%s836_s3 + $0x10] sm:$0xff] %v480_v45   ;;  %519 = vst [vmem:[%s836_s3 + $0x30] sm:$0xff] %v500_v46   ;;  %v309_v53 = vmul.f32 %v256_v8, %v158_v51  ;;  %v317_v54 = vmul.f32 %v296_v44, %v198_v52 }
 0x107   :  { %v485_v55 = vpack.c.bf16 %v310_v49, %v309_v53  ;;  %v505_v56 = vpack.c.bf16 %v318_v50, %v317_v54 }
 0x109   :  { %516 = vst [vmem:[%s836_s3 + $0x18] sm:$0xff] %v485_v55   ;;  %520 = vst [vmem:[%s836_s3 + $0x38] sm:$0xff] %v505_v56  }

// kernel: _olga_forward.4
= control target key start
LH: loop header
LB: loop body
LE: loop exit
PB: predicated region body
PF: predicated region fallthrough
CT: control target
= control target key end

     0   :  { %v605_v3 = vmov 0   ;;  %s794_s1 = inlined_call_operand.vmem [shape: f32[128,128], index: 1, kind: input, shape index: {}]   ;;  %s795_s0 = inlined_call_operand.vmem [shape: f32[128,128], index: 0, kind: input, shape index: {}]   ;;  %s796_s2 = inlined_call_operand.vmem [shape: f32[128,1], index: 2, kind: input, shape index: {}]   ;;  %s797_s3 = inlined_call_operand.vmem [shape: bf16[128,128], index: 3, kind: output, shape index: {}]  }
   0x1   :  { %v30_v0 = vld [vmem:[%s794_s1] sm:$0xff]  ;;  %v31_v1 = vld [vmem:[%s794_s1 + $0x8] sm:$0xff]  ;;  %v32_v2 = vld [vmem:[%s794_s1 + $0x10] sm:$0xff]  ;;  %604 = vset.pattern.permute.xlu1 %v605_v3  ;;  %603 = vset.pattern.permute.xlu0 %v605_v3 }
   0x2   :  { %v554_v4 = vpack.c.bf16 %v31_v1, %v30_v0  ;;  %v33_v5 = vld [vmem:[%s794_s1 + $0x18] sm:$0xff]  ;;  %v34_v7 = vld [vmem:[%s794_s1 + $0x20] sm:$0xff]  ;;  %v35_v8 = vld [vmem:[%s794_s1 + $0x28] sm:$0xff] }
   0x3   :  { %v558_v6 = vpack.c.bf16 %v33_v5, %v32_v2  ;;  %v562_v9 = vpack.c.bf16 %v35_v8, %v34_v7  ;;  %v14_v10 = vld [vmem:[%s795_s0] sm:$0xff]  ;;  %v36_v12 = vld [vmem:[%s794_s1 + $0x30] sm:$0xff]  ;;  %v37_v13 = vld [vmem:[%s794_s1 + $0x38] sm:$0xff] }
   0x4   :  { %555 = vmatprep.subr.bf16.mxu0 %v554_v4  ;;  %586 = vmatprep.subr.bf16.mxu1 %v554_v4  ;;  %v22_v11 = vld [vmem:[%s795_s0 + $0x40] sm:$0xff]  ;;  %v566_v14 = vpack.c.bf16 %v37_v13, %v36_v12  ;;  %v39_v16 = vld [vmem:[%s794_s1 + $0x48] sm:$0xff]  ;;  %v193_v17 = vld [vmem:[%s796_s2 + $0x10] sm:$0xff] }
   0x5   :  { %557 = vmatpush3.bf16.msra.mxu0 %v554_v4  ;;  %594 = vmatpush3.bf16.msra.mxu1 %v554_v4  ;;  %v38_v15 = vld [vmem:[%s794_s1 + $0x40] sm:$0xff]  ;;  %v194_v19 = vld [vmem:[%s796_s2 + $0x18] sm:$0xff]  ;;  %v40_v21 = vld [vmem:[%s794_s1 + $0x50] sm:$0xff] }
   0x6   :  { %559 = vmatprep.subr.bf16.mxu0 %v558_v6  ;;  %587 = vmatprep.subr.bf16.mxu1 %v558_v6  ;;  %v191_v18 = vld [vmem:[%s796_s2] sm:$0xff]  ;;  %v570_v20 = vpack.c.bf16 %v39_v16, %v38_v15  ;;  %v41_v22 = vld [vmem:[%s794_s1 + $0x58] sm:$0xff]  ;;  %v192_v23 = vld [vmem:[%s796_s2 + $0x8] sm:$0xff] }
   0x7   :  { %530 = vmatprep.mubr.f32.mxu0 %v14_v10  ;;  %542 = vmatprep.mubr.f32.mxu1 %v22_v11  ;;  %v196_v24 = vld [vmem:[%s796_s2 + $0x28] sm:$0xff]  ;;  %v574_v25 = vpack.c.bf16 %v41_v22, %v40_v21  ;;  %v42_v26 = vld [vmem:[%s794_s1 + $0x60] sm:$0xff]  ;;  %v198_v29 = vld [vmem:[%s796_s2 + $0x38] sm:$0xff] }
   0x8   :  { %219 = vperm.xlu1 %604, %v193_v17   ;;  %209 = vperm.xlu0 %603, %v191_v18   ;;  %v43_v27 = vld [vmem:[%s794_s1 + $0x68] sm:$0xff]  ;;  %v195_v28 = vld [vmem:[%s796_s2 + $0x20] sm:$0xff]  ;;  %v44_v31 = vld [vmem:[%s794_s1 + $0x70] sm:$0xff] }
   0x9   :  { %561 = vmatpush3.bf16.msra.mxu0 %v558_v6  ;;  %595 = vmatpush3.bf16.msra.mxu1 %v558_v6  ;;  %v578_v30 = vpack.c.bf16 %v43_v27, %v42_v26  ;;  %v45_v32 = vld [vmem:[%s794_s1 + $0x78] sm:$0xff]  ;;  %v197_v33 = vld [vmem:[%s796_s2 + $0x30] sm:$0xff]  ;;  %v200_v34 = vld [vmem:[%s796_s2 + $0x48] sm:$0xff] }
   0xa   :  { %563 = vmatprep.subr.bf16.mxu0 %v562_v9  ;;  %588 = vmatprep.subr.bf16.mxu1 %v562_v9  ;;  %v582_v35 = vpack.c.bf16 %v45_v32, %v44_v31  ;;  %v199_v36 = vld [vmem:[%s796_s2 + $0x40] sm:$0xff]  ;;  %v202_v37 = vld [vmem:[%s796_s2 + $0x58] sm:$0xff]  ;;  %v201_v38 = vld [vmem:[%s796_s2 + $0x50] sm:$0xff] }
   0xb   :  { %v15_v39 = vld [vmem:[%s795_s0 + $0x8] sm:$0xff]  ;;  %v16_v41 = vld [vmem:[%s795_s0 + $0x10] sm:$0xff]  ;;  %v203_v44 = vld [vmem:[%s796_s2 + $0x60] sm:$0xff] }
   0xc   :  { %224 = vperm.xlu1 %604, %v194_v19   ;;  %214 = vperm.xlu0 %603, %v192_v23   ;;  %v23_v40 = vld [vmem:[%s795_s0 + $0x48] sm:$0xff]  ;;  %v24_v42 = vld [vmem:[%s795_s0 + $0x50] sm:$0xff]  ;;  %v17_v45 = vld [vmem:[%s795_s0 + $0x18] sm:$0xff] }
   0xd   :  { %565 = vmatpush3.bf16.msra.mxu0 %v562_v9  ;;  %596 = vmatpush3.bf16.msra.mxu1 %v562_v9  ;;  %v204_v43 = vld [vmem:[%s796_s2 + $0x68] sm:$0xff]  ;;  %v25_v46 = vld [vmem:[%s795_s0 + $0x58] sm:$0xff]  ;;  %v18_v47 = vld [vmem:[%s795_s0 + $0x20] sm:$0xff] }
   0xe   :  { %567 = vmatprep.subr.bf16.mxu0 %v566_v14  ;;  %589 = vmatprep.subr.bf16.mxu1 %v566_v14  ;;  %v26_v48 = vld [vmem:[%s795_s0 + $0x60] sm:$0xff]  ;;  %v206_v49 = vld [vmem:[%s796_s2 + $0x78] sm:$0xff]  ;;  %v205_v50 = vld [vmem:[%s796_s2 + $0x70] sm:$0xff] }
   0xf   :  { %v19_v51 = vld [vmem:[%s795_s0 + $0x28] sm:$0xff]  ;;  %v20_v53 = vld [vmem:[%s795_s0 + $0x30] sm:$0xff]  ;;  %v21_v55 = vld [vmem:[%s795_s0 + $0x38] sm:$0xff] }
  0x10   :  { %234 = vperm.xlu1 %604, %v196_v24   ;;  %229 = vperm.xlu0 %603, %v195_v28   ;;  %v27_v52 = vld [vmem:[%s795_s0 + $0x68] sm:$0xff]  ;;  %v28_v54 = vld [vmem:[%s795_s0 + $0x70] sm:$0xff]  ;;  %v29_v56 = vld [vmem:[%s795_s0 + $0x78] sm:$0xff] }
  0x11   :  { %569 = vmatpush3.bf16.msra.mxu0 %v566_v14  ;;  %597 = vmatpush3.bf16.msra.mxu1 %v566_v14 }
  0x12   :  { %571 = vmatprep.subr.bf16.mxu0 %v570_v20  ;;  %590 = vmatprep.subr.bf16.mxu1 %v570_v20 }
  0x14   :  { %244 = vperm.xlu1 %604, %v198_v29   ;;  %239 = vperm.xlu0 %603, %v197_v33  }
  0x15   :  { %573 = vmatpush3.bf16.msra.mxu0 %v570_v20  ;;  %598 = vmatpush3.bf16.msra.mxu1 %v570_v20 }
  0x16   :  { %575 = vmatprep.subr.bf16.mxu0 %v574_v25  ;;  %591 = vmatprep.subr.bf16.mxu1 %v574_v25 }
  0x18   :  { %254 = vperm.xlu1 %604, %v200_v34   ;;  %249 = vperm.xlu0 %603, %v199_v36  }
  0x19   :  { %577 = vmatpush3.bf16.msra.mxu0 %v574_v25  ;;  %599 = vmatpush3.bf16.msra.mxu1 %v574_v25 }
  0x1a   :  { %579 = vmatprep.subr.bf16.mxu0 %v578_v30  ;;  %592 = vmatprep.subr.bf16.mxu1 %v578_v30 }
  0x1c   :  { %264 = vperm.xlu1 %604, %v202_v37   ;;  %259 = vperm.xlu0 %603, %v201_v38  }
  0x1d   :  { %581 = vmatpush3.bf16.msra.mxu0 %v578_v30  ;;  %600 = vmatpush3.bf16.msra.mxu1 %v578_v30 }
  0x1e   :  { %583 = vmatprep.subr.bf16.mxu0 %v582_v35  ;;  %593 = vmatprep.subr.bf16.mxu1 %v582_v35 }
  0x20   :  { %274 = vperm.xlu1 %604, %v204_v43   ;;  %269 = vperm.xlu0 %603, %v203_v44  }
  0x21   :  { %585 = vmatpush3.bf16.msra.mxu0 %v582_v35  ;;  %601 = vmatpush3.bf16.msra.mxu1 %v582_v35 }
  0x24   :  { %531 = vmatmul.mubr.f32.vlgmr.msra.gmra.mrb[0].mxu0 %v15_v39  ;;  %543 = vmatmul.mubr.f32.vlgmr.msra.gmra.mrb[0].mxu1 %v23_v40 }
  0x25   :  { %533 = vmatprep.mubr.f32.mxu0 %v16_v41  ;;  %545 = vmatprep.mubr.f32.mxu1 %v24_v42 }
  0x26   :  { %284 = vperm.xlu1 %604, %v206_v49   ;;  %279 = vperm.xlu0 %603, %v205_v50  }
  0x28   :  { %534 = vmatmul.mubr.f32.gmra.mrb[2].mxu0 %v17_v45  ;;  %546 = vmatmul.mubr.f32.gmra.mrb[2].mxu1 %v25_v46 }
  0x29   :  { %536 = vmatprep.mubr.f32.mxu0 %v18_v47  ;;  %548 = vmatprep.mubr.f32.mxu1 %v26_v48 }
  0x2c   :  { %537 = vmatmul.mubr.f32.gmra.mrb[4].mxu0 %v19_v51  ;;  %549 = vmatmul.mubr.f32.gmra.mrb[4].mxu1 %v27_v52 }
  0x2d   :  { %539 = vmatprep.mubr.f32.mxu0 %v20_v53  ;;  %551 = vmatprep.mubr.f32.mxu1 %v28_v54 }
  0x30   :  { %540 = vmatmul.mubr.f32.gmra.mrb[6].mxu0 %v21_v55  ;;  %552 = vmatmul.mubr.f32.gmra.mrb[6].mxu1 %v29_v56 }
  0x87   :  { %v220_v57 = vpop.permute.xlu1 %219  ;;  %v210_v58 = vpop.permute.xlu0 %209 }
  0x8b   :  { %v225_v59 = vpop.permute.xlu1 %224  ;;  %v215_v60 = vpop.permute.xlu0 %214 }
  0x8f   :  { %v235_v61 = vpop.permute.xlu1 %234  ;;  %v230_v62 = vpop.permute.xlu0 %229 }
  0x93   :  { %v245_v63 = vpop.permute.xlu1 %244  ;;  %v240_v0 = vpop.permute.xlu0 %239 }
  0x97   :  { %v255_v1 = vpop.permute.xlu1 %254  ;;  %v250_v2 = vpop.permute.xlu0 %249 }
  0x9b   :  { %v265_v3 = vpop.permute.xlu1 %264  ;;  %v260_v4 = vpop.permute.xlu0 %259 }
  0x9f   :  { %v275_v13 = vpop.permute.xlu1 %274  ;;  %v270_v14 = vpop.permute.xlu0 %269 }
  0xa5   :  { %v285_v35 = vpop.permute.xlu1 %284  ;;  %v280_v36 = vpop.permute.xlu0 %279 }
  0xf7   :  { %v532_v5 = vpop.f32.mrb[0].mxu0  ;;  %v544_v6 = vpop.f32.mrb[0].mxu1 }
  0xf8   :  { %v288_v7 = vmul.f32 %v532_v5, %v215_v60  ;;  %v296_v8 = vmul.f32 %v544_v6, %v255_v1  ;;  %v112_v9 = vpop.f32.mrb[1].mxu0  ;;  %v152_v10 = vpop.f32.mrb[1].mxu1 }
  0xf9   :  { %v287_v11 = vmul.f32 %v210_v58, %v112_v9  ;;  %v295_v12 = vmul.f32 %v250_v2, %v152_v10 }
  0xfb   :  { %v422_v15 = vpack.c.bf16 %v288_v7, %v287_v11  ;;  %v442_v16 = vpack.c.bf16 %v296_v8, %v295_v12  ;;  %v535_v17 = vpop.f32.mrb[2].mxu0  ;;  %v547_v18 = vpop.f32.mrb[2].mxu1 }
  0xfc   :  { %v290_v19 = vmul.f32 %v535_v17, %v225_v59  ;;  %v298_v20 = vmul.f32 %v547_v18, %v265_v3  ;;  %v122_v21 = vpop.f32.mrb[3].mxu0  ;;  %v162_v22 = vpop.f32.mrb[3].mxu1 }
  0xfd   :  { %423 = vst [vmem:[%s797_s3] sm:$0xff] %v422_v15   ;;  %462 = vst [vmem:[%s797_s3 + $0x20] sm:$0xff] %v442_v16   ;;  %v289_v23 = vmul.f32 %v220_v57, %v122_v21  ;;  %v297_v24 = vmul.f32 %v260_v4, %v162_v22 }
  0xff   :  { %v427_v25 = vpack.c.bf16 %v290_v19, %v289_v23  ;;  %v447_v26 = vpack.c.bf16 %v298_v20, %v297_v24  ;;  %v538_v27 = vpop.f32.mrb[4].mxu0  ;;  %v550_v28 = vpop.f32.mrb[4].mxu1 }
 0x100   :  { %v292_v29 = vmul.f32 %v538_v27, %v235_v61  ;;  %v300_v30 = vmul.f32 %v550_v28, %v275_v13  ;;  %v132_v31 = vpop.f32.mrb[5].mxu0  ;;  %v172_v32 = vpop.f32.mrb[5].mxu1 }
 0x101   :  { %459 = vst [vmem:[%s797_s3 + $0x8] sm:$0xff] %v427_v25   ;;  %463 = vst [vmem:[%s797_s3 + $0x28] sm:$0xff] %v447_v26   ;;  %v291_v33 = vmul.f32 %v230_v62, %v132_v31  ;;  %v299_v34 = vmul.f32 %v270_v14, %v172_v32 }
 0x103   :  { %v432_v37 = vpack.c.bf16 %v292_v29, %v291_v33  ;;  %v452_v38 = vpack.c.bf16 %v300_v30, %v299_v34  ;;  %v541_v39 = vpop.f32.mrb[6].mxu0  ;;  %v553_v40 = vpop.f32.mrb[6].mxu1 }
 0x104   :  { %v294_v41 = vmul.f32 %v541_v39, %v245_v63  ;;  %v302_v42 = vmul.f32 %v553_v40, %v285_v35  ;;  %v142_v43 = vpop.f32.mrb[7].mxu0  ;;  %v182_v44 = vpop.f32.mrb[7].mxu1 }
 0x105   :  { %460 = vst [vmem:[%s797_s3 + $0x10] sm:$0xff] %v432_v37   ;;  %464 = vst [vmem:[%s797_s3 + $0x30] sm:$0xff] %v452_v38   ;;  %v293_v45 = vmul.f32 %v240_v0, %v142_v43  ;;  %v301_v46 = vmul.f32 %v280_v36, %v182_v44 }
 0x107   :  { %v437_v47 = vpack.c.bf16 %v294_v41, %v293_v45  ;;  %v457_v48 = vpack.c.bf16 %v302_v42, %v301_v46 }
 0x109   :  { %461 = vst [vmem:[%s797_s3 + $0x18] sm:$0xff] %v437_v47   ;;  %465 = vst [vmem:[%s797_s3 + $0x38] sm:$0xff] %v457_v48  }

// kernel: _olga_forward.7
= control target key start
LH: loop header
LB: loop body
LE: loop exit
PB: predicated region body
PF: predicated region fallthrough
CT: control target
= control target key end

     0   :  { %v572_v1 = vmov 0   ;;  %s762_s1 = inlined_call_operand.vmem [shape: bf16[128,128], index: 1, kind: input, shape index: {}]   ;;  %s763_s0 = inlined_call_operand.vmem [shape: s8[128,128], index: 0, kind: input, shape index: {}]   ;;  %s764_s2 = inlined_call_operand.vmem [shape: f32[128,1], index: 2, kind: input, shape index: {}]   ;;  %s765_s3 = inlined_call_operand.vmem [shape: f32[1,128], index: 3, kind: input, shape index: {}]   ;;  %s766_s4 = inlined_call_operand.vmem [shape: f32[128,128], index: 4, kind: output, shape index: {}]  }
   0x1   :  { %v532_v0 = vld [vmem:[%s762_s1] sm:$0xff]   ;;  %531 = vset.pattern.permute.xlu1 %v572_v1  ;;  %530 = vset.pattern.permute.xlu0 %v572_v1  ;;  %v533_v2 = vld [vmem:[%s762_s1 + $0x8] sm:$0xff]   ;;  %v534_v3 = vld [vmem:[%s762_s1 + $0x10] sm:$0xff]  }
   0x2   :  { %481 = vmatprep.subr.bf16.mxu0 %v532_v0  ;;  %513 = vmatprep.subr.bf16.mxu1 %v532_v0  ;;  %v535_v4 = vld [vmem:[%s762_s1 + $0x18] sm:$0xff]   ;;  %v613_v5 = vld [vmem:[%s763_s0] sm:$0xff]  ;;  %v618_v6 = vld [vmem:[%s763_s0 + $0x10] sm:$0xff] }
   0x3   :  { %482 = vmatpush3.bf16.msra.mxu0 %v532_v0  ;;  %521 = vmatpush3.bf16.msra.mxu1 %v532_v0  ;;  %v42_v7 = vunpack.c.l.s8.bf16 %v613_v5  ;;  %v46_v8 = vunpack.c.l.s8.bf16 %v618_v6  ;;  %v269_v9 = vld [vmem:[%s764_s2 + $0x10] sm:$0xff]  ;;  %v267_v10 = vld [vmem:[%s764_s2] sm:$0xff]  ;;  %v270_v11 = vld [vmem:[%s764_s2 + $0x18] sm:$0xff]  ;;  %v43_v27 = vunpack.c.h.s8.bf16 %v613_v5  ;;  %v47_v28 = vunpack.c.h.s8.bf16 %v618_v6 }
   0x4   :  { %483 = vmatprep.subr.bf16.mxu0 %v533_v2  ;;  %514 = vmatprep.subr.bf16.mxu1 %v533_v2  ;;  %v268_v12 = vld [vmem:[%s764_s2 + $0x8] sm:$0xff]  ;;  %v536_v13 = vld [vmem:[%s762_s1 + $0x20] sm:$0xff]   ;;  %v274_v17 = vld [vmem:[%s764_s2 + $0x38] sm:$0xff] }
   0x5   :  { %311 = vperm.xlu1 %531, %v269_v9   ;;  %301 = vperm.xlu0 %530, %v267_v10   ;;  %v272_v14 = vld [vmem:[%s764_s2 + $0x28] sm:$0xff]  ;;  %v271_v15 = vld [vmem:[%s764_s2 + $0x20] sm:$0xff]  ;;  %v273_v18 = vld [vmem:[%s764_s2 + $0x30] sm:$0xff] }
   0x6   :  { %497 = vmatprep.mubr.bf16.mxu0 %v42_v7  ;;  %505 = vmatprep.mubr.bf16.mxu1 %v46_v8  ;;  %v537_v16 = vld [vmem:[%s762_s1 + $0x28] sm:$0xff]   ;;  %v538_v19 = vld [vmem:[%s762_s1 + $0x30] sm:$0xff]   ;;  %v275_v21 = vld [vmem:[%s764_s2 + $0x40] sm:$0xff] }
   0x7   :  { %484 = vmatpush3.bf16.msra.mxu0 %v533_v2  ;;  %522 = vmatpush3.bf16.msra.mxu1 %v533_v2  ;;  %v276_v20 = vld [vmem:[%s764_s2 + $0x48] sm:$0xff]  ;;  %v539_v22 = vld [vmem:[%s762_s1 + $0x38] sm:$0xff]   ;;  %v277_v24 = vld [vmem:[%s764_s2 + $0x50] sm:$0xff] }
   0x8   :  { %485 = vmatprep.subr.bf16.mxu0 %v534_v3  ;;  %515 = vmatprep.subr.bf16.mxu1 %v534_v3  ;;  %v278_v23 = vld [vmem:[%s764_s2 + $0x58] sm:$0xff]  ;;  %v39_v25 = vld [vmem:[%s763_s0 + $0x8] sm:$0xff]  ;;  %v279_v32 = vld [vmem:[%s764_s2 + $0x60] sm:$0xff] }
   0x9   :  { %316 = vperm.xlu1 %531, %v270_v11   ;;  %306 = vperm.xlu0 %530, %v268_v12   ;;  %v41_v26 = vld [vmem:[%s763_s0 + $0x18] sm:$0xff]  ;;  %v44_v29 = vunpack.c.l.s8.bf16 %v39_v25  ;;  %v280_v31 = vld [vmem:[%s764_s2 + $0x68] sm:$0xff]  ;;  %v281_v34 = vld [vmem:[%s764_s2 + $0x70] sm:$0xff]  ;;  %v45_v35 = vunpack.c.h.s8.bf16 %v39_v25 }
   0xa   :  { %v48_v30 = vunpack.c.l.s8.bf16 %v41_v26  ;;  %v282_v33 = vld [vmem:[%s764_s2 + $0x78] sm:$0xff]  ;;  %v49_v36 = vunpack.c.h.s8.bf16 %v41_v26  ;;  %v695_v52 = vld [vmem:[%s765_s3] ss:$0 sm:$0xff] }
   0xb   :  { %486 = vmatpush3.bf16.msra.mxu0 %v534_v3  ;;  %523 = vmatpush3.bf16.msra.mxu1 %v534_v3 }
   0xc   :  { %487 = vmatprep.subr.bf16.mxu0 %v535_v4  ;;  %516 = vmatprep.subr.bf16.mxu1 %v535_v4 }
   0xd   :  { %326 = vperm.xlu1 %531, %v272_v14   ;;  %321 = vperm.xlu0 %530, %v271_v15  }
   0xf   :  { %488 = vmatpush3.bf16.msra.mxu0 %v535_v4  ;;  %524 = vmatpush3.bf16.msra.mxu1 %v535_v4 }
  0x10   :  { %489 = vmatprep.subr.bf16.mxu0 %v536_v13  ;;  %517 = vmatprep.subr.bf16.mxu1 %v536_v13 }
  0x11   :  { %336 = vperm.xlu1 %531, %v274_v17   ;;  %331 = vperm.xlu0 %530, %v273_v18  }
  0x13   :  { %490 = vmatpush3.bf16.msra.mxu0 %v536_v13  ;;  %525 = vmatpush3.bf16.msra.mxu1 %v536_v13 }
  0x14   :  { %491 = vmatprep.subr.bf16.mxu0 %v537_v16  ;;  %518 = vmatprep.subr.bf16.mxu1 %v537_v16 }
  0x15   :  { %346 = vperm.xlu1 %531, %v276_v20   ;;  %341 = vperm.xlu0 %530, %v275_v21  }
  0x17   :  { %492 = vmatpush3.bf16.msra.mxu0 %v537_v16  ;;  %526 = vmatpush3.bf16.msra.mxu1 %v537_v16 }
  0x18   :  { %493 = vmatprep.subr.bf16.mxu0 %v538_v19  ;;  %519 = vmatprep.subr.bf16.mxu1 %v538_v19 }
  0x19   :  { %356 = vperm.xlu1 %531, %v278_v23   ;;  %351 = vperm.xlu0 %530, %v277_v24  }
  0x1b   :  { %494 = vmatpush3.bf16.msra.mxu0 %v538_v19  ;;  %527 = vmatpush3.bf16.msra.mxu1 %v538_v19 }
  0x1c   :  { %495 = vmatprep.subr.bf16.mxu0 %v539_v22  ;;  %520 = vmatprep.subr.bf16.mxu1 %v539_v22 }
  0x1d   :  { %366 = vperm.xlu1 %531, %v280_v31   ;;  %361 = vperm.xlu0 %530, %v279_v32  }
  0x1f   :  { %496 = vmatpush3.bf16.msra.mxu0 %v539_v22  ;;  %528 = vmatpush3.bf16.msra.mxu1 %v539_v22 }
  0x21   :  { %376 = vperm.xlu1 %531, %v282_v33   ;;  %371 = vperm.xlu0 %530, %v281_v34  }
  0x22   :  { %498 = vmatmul.mubr.bf16.vlgmr.msra.gmra.mrb[0].mxu0 %v43_v27  ;;  %506 = vmatmul.mubr.bf16.vlgmr.msra.gmra.mrb[0].mxu1 %v47_v28 }
  0x23   :  { %501 = vmatprep.mubr.bf16.mxu0 %v44_v29  ;;  %509 = vmatprep.mubr.bf16.mxu1 %v48_v30 }
  0x2a   :  { %502 = vmatmul.mubr.bf16.gmra.mrb[4].mxu0 %v45_v35  ;;  %510 = vmatmul.mubr.bf16.gmra.mrb[4].mxu1 %v49_v36 }
  0x84   :  { %v312_v37 = vpop.permute.xlu1 %311  ;;  %v302_v38 = vpop.permute.xlu0 %301 }
  0x88   :  { %v317_v39 = vpop.permute.xlu1 %316  ;;  %v307_v40 = vpop.permute.xlu0 %306 }
  0x8c   :  { %v690_v41 = vpop.permute.xlu1 %326  ;;  %v322_v42 = vpop.permute.xlu0 %321 }
  0x90   :  { %v337_v43 = vpop.permute.xlu1 %336  ;;  %v332_v44 = vpop.permute.xlu0 %331 }
  0x94   :  { %v347_v45 = vpop.permute.xlu1 %346  ;;  %v342_v46 = vpop.permute.xlu0 %341 }
  0x98   :  { %v357_v47 = vpop.permute.xlu1 %356  ;;  %v352_v48 = vpop.permute.xlu0 %351 }
  0x9c   :  { %v367_v49 = vpop.permute.xlu1 %366  ;;  %v362_v50 = vpop.permute.xlu0 %361 }
  0xa0   :  { %v377_v10 = vpop.permute.xlu1 %376  ;;  %v372_v11 = vpop.permute.xlu0 %371 }
  0xf5   :  { %v499_v51 = vpop.f32.mrb[0].mxu0  ;;  %v507_v53 = vpop.f32.mrb[0].mxu1 }
  0xf6   :  { %v381_v54 = vmul.f32 %v499_v51, %v312_v37  ;;  %v389_v55 = vmul.f32 %v507_v53, %v352_v48  ;;  %v169_v56 = vpop.f32.mrb[1].mxu0  ;;  %v201_v57 = vpop.f32.mrb[1].mxu1 }
  0xf7   :  { %v379_v58 = vmul.f32 %v302_v38, %v169_v56  ;;  %v387_v59 = vmul.f32 %v342_v46, %v201_v57  ;;  %v500_v60 = vpop.f32.mrb[2].mxu0  ;;  %v508_v61 = vpop.f32.mrb[2].mxu1 }
  0xf8   :  { %v404_v62 = vadd.f32 %v695_v52, %v381_v54  ;;  %v412_v63 = vadd.f32 %v695_v52, %v389_v55  ;;  %v382_v0 = vmul.f32 %v500_v60, %v317_v39  ;;  %v390_v1 = vmul.f32 %v508_v61, %v357_v47  ;;  %v172_v2 = vpop.f32.mrb[3].mxu0  ;;  %v204_v3 = vpop.f32.mrb[3].mxu1 }
  0xf9   :  { %v402_v4 = vadd.f32 %v695_v52, %v379_v58  ;;  %v410_v5 = vadd.f32 %v695_v52, %v387_v59  ;;  %v380_v6 = vmul.f32 %v307_v40, %v172_v2  ;;  %v388_v7 = vmul.f32 %v347_v45, %v204_v3 }
  0xfa   :  { %540 = vtanh.f32 %v404_v62  ;;  %v405_v8 = vadd.f32 %v695_v52, %v382_v0  ;;  %v413_v9 = vadd.f32 %v695_v52, %v390_v1 }
  0xfb   :  { %542 = vtanh.f32 %v412_v63  ;;  %v403_v12 = vadd.f32 %v695_v52, %v380_v6  ;;  %v411_v13 = vadd.f32 %v695_v52, %v388_v7 }
  0xfc   :  { %544 = vtanh.f32 %v402_v4 }
  0xfd   :  { %546 = vtanh.f32 %v410_v5  ;;  %v503_v14 = vpop.f32.mrb[4].mxu0  ;;  %v511_v15 = vpop.f32.mrb[4].mxu1 }
  0xfe   :  { %548 = vtanh.f32 %v405_v8  ;;  %v385_v16 = vmul.f32 %v503_v14, %v332_v44  ;;  %v393_v17 = vmul.f32 %v511_v15, %v372_v11  ;;  %v185_v18 = vpop.f32.mrb[5].mxu0  ;;  %v217_v19 = vpop.f32.mrb[5].mxu1 }
  0xff   :  { %550 = vtanh.f32 %v413_v9  ;;  %v383_v20 = vmul.f32 %v322_v42, %v185_v18  ;;  %v391_v21 = vmul.f32 %v362_v50, %v217_v19  ;;  %v504_v22 = vpop.f32.mrb[6].mxu0  ;;  %v512_v23 = vpop.f32.mrb[6].mxu1 }
 0x100   :  { %552 = vtanh.f32 %v403_v12  ;;  %v408_v24 = vadd.f32 %v695_v52, %v385_v16  ;;  %v416_v25 = vadd.f32 %v695_v52, %v393_v17  ;;  %v386_v26 = vmul.f32 %v504_v22, %v337_v43  ;;  %v188_v27 = vpop.f32.mrb[7].mxu0  ;;  %v220_v28 = vpop.f32.mrb[7].mxu1 }
 0x101   :  { %554 = vtanh.f32 %v411_v13  ;;  %v406_v29 = vadd.f32 %v695_v52, %v383_v20  ;;  %v414_v30 = vadd.f32 %v695_v52, %v391_v21  ;;  %v394_v31 = vmul.f32 %v512_v23, %v377_v10 }
 0x102   :  { %556 = vtanh.f32 %v408_v24  ;;  %v409_v32 = vadd.f32 %v695_v52, %v386_v26  ;;  %v384_v33 = vmul.f32 %v690_v41, %v188_v27  ;;  %v392_v34 = vmul.f32 %v367_v49, %v220_v28 }
 0x103   :  { %558 = vtanh.f32 %v416_v25  ;;  %v417_v35 = vadd.f32 %v695_v52, %v394_v31 }
 0x104   :  { %v541_v36 = vpop.eup %540  ;;  %560 = vtanh.f32 %v406_v29  ;;  %v407_v37 = vadd.f32 %v695_v52, %v384_v33  ;;  %v415_v39 = vadd.f32 %v695_v52, %v392_v34 }
 0x105   :  { %v543_v38 = vpop.eup %542  ;;  %436 = vst [vmem:[%s766_s4 + $0x10] sm:$0xff] %v541_v36  ;;  %562 = vtanh.f32 %v414_v30 }
 0x106   :  { %v545_v40 = vpop.eup %544  ;;  %444 = vst [vmem:[%s766_s4 + $0x50] sm:$0xff] %v543_v38  ;;  %564 = vtanh.f32 %v409_v32 }
 0x107   :  { %v547_v41 = vpop.eup %546  ;;  %434 = vst [vmem:[%s766_s4] sm:$0xff] %v545_v40  ;;  %566 = vtanh.f32 %v417_v35 }
 0x108   :  { %v549_v42 = vpop.eup %548  ;;  %442 = vst [vmem:[%s766_s4 + $0x40] sm:$0xff] %v547_v41  ;;  %568 = vtanh.f32 %v407_v37 }
 0x109   :  { %v551_v43 = vpop.eup %550  ;;  %437 = vst [vmem:[%s766_s4 + $0x18] sm:$0xff] %v549_v42  ;;  %570 = vtanh.f32 %v415_v39 }
 0x10a   :  { %v553_v44 = vpop.eup %552  ;;  %445 = vst [vmem:[%s766_s4 + $0x58] sm:$0xff] %v551_v43 }
 0x10b   :  { %v555_v45 = vpop.eup %554  ;;  %435 = vst [vmem:[%s766_s4 + $0x8] sm:$0xff] %v553_v44 }
 0x10c   :  { %v557_v46 = vpop.eup %556  ;;  %443 = vst [vmem:[%s766_s4 + $0x48] sm:$0xff] %v555_v45 }
 0x10d   :  { %v559_v47 = vpop.eup %558  ;;  %440 = vst [vmem:[%s766_s4 + $0x30] sm:$0xff] %v557_v46 }
 0x10e   :  { %v561_v48 = vpop.eup %560  ;;  %448 = vst [vmem:[%s766_s4 + $0x70] sm:$0xff] %v559_v47 }
 0x10f   :  { %v563_v49 = vpop.eup %562  ;;  %438 = vst [vmem:[%s766_s4 + $0x20] sm:$0xff] %v561_v48 }
 0x110   :  { %v565_v50 = vpop.eup %564  ;;  %446 = vst [vmem:[%s766_s4 + $0x60] sm:$0xff] %v563_v49 }
 0x111   :  { %v567_v51 = vpop.eup %566  ;;  %441 = vst [vmem:[%s766_s4 + $0x38] sm:$0xff] %v565_v50 }
 0x112   :  { %v569_v52 = vpop.eup %568  ;;  %449 = vst [vmem:[%s766_s4 + $0x78] sm:$0xff] %v567_v51 }
 0x113   :  { %v571_v53 = vpop.eup %570  ;;  %439 = vst [vmem:[%s766_s4 + $0x28] sm:$0xff] %v569_v52 }
 0x114   :  { %447 = vst [vmem:[%s766_s4 + $0x68] sm:$0xff] %v571_v53 }

</bundles_post_ra>
